<compile_context>
chip_gen: v7x
topology: tpu7x:2x2x1
jax: 0.10.0
libtpu: 0.0.40
codegen_flags: <defaults>
</compile_context>

<pallas_src>
import functools

import numpy as np

import jax
import jax.numpy as jnp
from jax.experimental import pallas as pl
from jax.experimental.pallas import tpu as pltpu

KERNEL_SIZE = 7
PAD = 3  # padding = 3 for kernel_size 7 (same as the PyTorch module)


def _largest_divisor_leq(n, cap):
    cap = max(1, min(n, cap))
    for d in range(cap, 0, -1):
        if n % d == 0:
            return d
    return 1


def _fold_conv_taps(w, H, W):
    """Host-side precompute for the 7x7 'same' conv on the flattened H*W axis.

    For output flat index p (row i = p//W, col j = p%W) and tap (di, dj) with
    offsets (oi, oj) = (di-PAD, dj-PAD):
        out[p] += w[di,dj] * m_flat[(p + oi*W + oj) mod HW] * valid(i+oi, j+oj)
    The boundary mask is data-independent (numpy); only the multiply by the conv
    weight stays traceable.  Returns (static per-tap roll shifts, (49, HW) f32
    weight*mask table).
    """
    K = int(w.shape[0])
    pad = K // 2
    HW = H * W
    p = np.arange(HW)
    pi, pj = p // W, p % W
    masks, shifts = [], []
    for di in range(K):
        oi = di - pad
        for dj in range(K):
            oj = dj - pad
            valid = ((pi + oi >= 0) & (pi + oi < H) &
                     (pj + oj >= 0) & (pj + oj < W))
            masks.append(valid.astype(np.float32))
            # jnp.roll semantics: result[p] = x[(p - shift) mod N]; we want
            # result[p] = x[(p + oi*W + oj) mod N]  =>  shift = -(oi*W + oj).
            shifts.append(int((-(oi * W + oj)) % HW))
    masks = jnp.asarray(np.stack(masks, axis=0))                    # (K*K, HW)
    wmask = masks * w.astype(jnp.float32).reshape(K * K, 1)         # fold conv weight
    return tuple(shifts), wmask


def _spatial_attention_kernel(wmask_ref, x_ref, o_ref, m_ref, *, shifts):
    """wmask_ref: (49, HW) f32 VMEM (resident); x_ref: (Bb, Cb, HW) VMEM;
    o_ref: (Bb, 1, HW) VMEM; m_ref: (Bb, HW) f32 scratch (running channel max)."""
    c_step = pl.program_id(1)

    # --- running channel max (torch.max(x, dim=1)) across the C-tile axis ---
    @pl.when(c_step == 0)
    def _():
        m_ref[...] = jnp.full_like(m_ref, -jnp.inf)

    tile_max = jnp.max(x_ref[...], axis=1)                      # reduce in input dtype
    m_ref[...] = jnp.maximum(m_ref[...], tile_max.astype(jnp.float32))

    # --- on the last channel step: 7x7 conv (49 rolled taps) + sigmoid ---
    @pl.when(c_step == pl.num_programs(1) - 1)
    def _():
        m = m_ref[...]                                           # (Bb, HW) f32
        acc = jnp.zeros_like(m)
        for tap, s in enumerate(shifts):                         # static unroll, 1 live acc
            shifted = m if s == 0 else pltpu.roll(m, s, 1)       # XLU lane rotate
            acc = acc + shifted * wmask_ref[pl.ds(tap, 1), :]    # (1,HW) bcast over Bb
        o_ref[...] = jax.nn.sigmoid(acc)[:, None, :].astype(o_ref.dtype)


def spatial_attention(x, w):
    """x: [B, C, H, W], w: [7, 7] -> [B, 1, H, W]."""
    B, C, H, W = x.shape
    HW = H * W
    K = int(w.shape[0])
    itemsize = x.dtype.itemsize

    # Host-side: per-tap flat roll shifts + folded (weight * boundary-mask) table.
    shifts, wmask = _fold_conv_taps(w, H, W)

    # ---- block-size heuristics ----
    # Batch block: aim for a reasonably sized x block per grid step (per-step
    # overhead ~0.35us), keep the f32 working set (m/acc/shifted) register-friendly,
    # and keep >= 2 parallel batch steps when B >= 2 (v7x has 2 TensorCores).
    bb_cap = max(1, (1 << 20) // max(1, C * HW * itemsize))
    bb_cap = min(bb_cap, max(1, (32 << 10) // (HW * 4)))
    Bb = _largest_divisor_leq(B, bb_cap)
    if B >= 2 and B // Bb < 2:
        Bb = _largest_divisor_leq(B, B // 2)
    # Channel block: full C unless the per-step x block would exceed ~2 MiB
    # (keeps double-buffering comfortable even under v7x's smaller VMEM).
    cb_cap = max(1, (2 << 20) // max(1, Bb * HW * itemsize))
    Cb = _largest_divisor_leq(C, cb_cap)

    grid = (B // Bb, C // Cb)
    xf = x.reshape(B, C, HW)                                    # lane-dense view (free)

    kernel = functools.partial(_spatial_attention_kernel, shifts=shifts)

    out = pl.pallas_call(
        kernel,
        out_shape=jax.ShapeDtypeStruct((B, 1, HW), x.dtype),
        grid=grid,
        in_specs=[
            pl.BlockSpec((K * K, HW), lambda b, c: (0, 0)),      # resident weight*mask table
            pl.BlockSpec((Bb, Cb, HW), lambda b, c: (b, c, 0)),  # lane-dense x block
        ],
        out_specs=pl.BlockSpec((Bb, 1, HW), lambda b, c: (b, 0, 0)),
        scratch_shapes=[pltpu.VMEM((Bb, HW), jnp.float32)],      # running channel max
        compiler_params=pltpu.CompilerParams(
            dimension_semantics=("parallel", "arbitrary")),      # megacore on batch axis
    )(wmask, xf)

    # glue: restore the keepdim=True channel axis and the spatial dims.
    return out.reshape(B, 1, H, W)


def spatial_attention_ref(x, w):
    """Pure-JAX reference matching the PyTorch forward."""
    max_out = jnp.max(x, axis=1, keepdims=True)                  # [B,1,H,W]
    conv = jax.lax.conv_general_dilated(
        max_out, w[None, None, :, :], window_strides=(1, 1),
        padding=((PAD, PAD), (PAD, PAD)),
        dimension_numbers=("NCHW", "OIHW", "NCHW"),
        precision=jax.lax.Precision.HIGHEST)
    return jax.nn.sigmoid(conv)


if __name__ == "__main__":
    key = jax.random.PRNGKey(0)
    kx, kw = jax.random.split(key)

    # Small shapes consistent with the module: B=2, C=4, H=W=16
    x = jax.random.normal(kx, (2, 4, 16, 16), dtype=jnp.float32)

    # Deterministic conv weight init (Conv2d(1,1,7) default bound = 1/sqrt(1*7*7))
    bound = 1.0 / 7.0
    w = jax.random.uniform(kw, (KERNEL_SIZE, KERNEL_SIZE), jnp.float32,
                           minval=-bound, maxval=bound)

    out = jax.block_until_ready(spatial_attention(x, w))
    ref = spatial_attention_ref(x, w)

    assert out.shape == (2, 1, 16, 16)
    assert jnp.allclose(out, ref, atol=1e-5, rtol=1e-5), float(jnp.max(jnp.abs(out - ref)))

    print("KERNEL_OK")
</pallas_src>

<mosaic_0001>
module attributes {stable_mosaic.version = 11 : i64} {
  func.func @_spatial_attention_kernel(%arg0: i32, %arg1: i32, %arg2: memref<49x256xf32, #tpu.memory_space<vmem>>, %arg3: memref<1x4x256xf32, #tpu.memory_space<vmem>>, %arg4: memref<1x1x256xf32, #tpu.memory_space<vmem>>, %arg5: memref<1x256xf32, #tpu.memory_space<vmem>>) attributes {dimension_semantics = [#tpu.dimension_semantics<parallel>, #tpu.dimension_semantics<arbitrary>], iteration_bounds = array<i64: 2, 1>, scalar_prefetch = 0 : i64, scratch_operands = 1 : i64, tpu.core_type = #tpu.core_type<tc>, window_params = [{pipeline_mode = #tpu.pipeline_mode<synchronous>, transform_indices = @transform_0, window_bounds = array<i64: 49, 256>}, {transform_indices = @transform_1, window_bounds = array<i64: 1, 4, 256>}, {transform_indices = @transform_2, window_bounds = array<i64: 1, 1, 256>}]} {
    %c0_i32 = arith.constant 0 : i32
    %0 = arith.cmpi eq, %arg1, %c0_i32 : i32
    %1 = arith.extui %0 : i1 to i32
    %c0_i32_0 = arith.constant 0 : i32
    %2 = arith.cmpi ne, %1, %c0_i32_0 : i32
    scf.if %2 {
      %cst_9 = arith.constant 0xFF800000 : f32
      %11 = vector.broadcast %cst_9 : f32 to vector<1x256xf32>
      %c0_10 = arith.constant 0 : index
      %c0_11 = arith.constant 0 : index
      %12 = vector.load %arg5[%c0_10, %c0_11] : memref<1x256xf32, #tpu.memory_space<vmem>>, vector<1x256xf32>
      tpu.vector_store %arg5[%c0_10, %c0_11], %11 {strides = array<i32>} : memref<1x256xf32, #tpu.memory_space<vmem>>, vector<1x256xf32>,
    } else {
    }
    %c0 = arith.constant 0 : index
    %c0_1 = arith.constant 0 : index
    %c0_2 = arith.constant 0 : index
    %3 = vector.load %arg3[%c0, %c0_1, %c0_2] : memref<1x4x256xf32, #tpu.memory_space<vmem>>, vector<1x4x256xf32>
    %cst = arith.constant dense<0xFF800000> : vector<1x256xf32>
    %4 = vector.multi_reduction <maximumf>, %3, %cst [1] : vector<1x4x256xf32> to vector<1x256xf32>
    %c0_3 = arith.constant 0 : index
    %c0_4 = arith.constant 0 : index
    %5 = vector.load %arg5[%c0_3, %c0_4] : memref<1x256xf32, #tpu.memory_space<vmem>>, vector<1x256xf32>
    %6 = arith.maximumf %5, %4 : vector<1x256xf32>
    %c0_5 = arith.constant 0 : index
    %c0_6 = arith.constant 0 : index
    %7 = vector.load %arg5[%c0_5, %c0_6] : memref<1x256xf32, #tpu.memory_space<vmem>>, vector<1x256xf32>
    tpu.vector_store %arg5[%c0_5, %c0_6], %6 {strides = array<i32>} : memref<1x256xf32, #tpu.memory_space<vmem>>, vector<1x256xf32>,
    %c0_i32_7 = arith.constant 0 : i32
    %8 = arith.cmpi eq, %arg1, %c0_i32_7 : i32
    %9 = arith.extui %8 : i1 to i32
    %c0_i32_8 = arith.constant 0 : i32
    %10 = arith.cmpi ne, %9, %c0_i32_8 : i32
    scf.if %10 {
      %c0_9 = arith.constant 0 : index
      %c0_10 = arith.constant 0 : index
      %11 = vector.load %arg5[%c0_9, %c0_10] : memref<1x256xf32, #tpu.memory_space<vmem>>, vector<1x256xf32>
      %cst_11 = arith.constant 0.000000e+00 : f32
      %12 = vector.broadcast %cst_11 : f32 to vector<1x256xf32>
      %c51_i32 = arith.constant 51 : i32
      %13 = tpu.dynamic_rotate %11 by %c51_i32 dim 1 : vector<1x256xf32>, i32 -> vector<1x256xf32>
      %c0_12 = arith.constant 0 : index
      %c0_13 = arith.constant 0 : index
      %14 = vector.load %arg2[%c0_12, %c0_13] : memref<49x256xf32, #tpu.memory_space<vmem>>, vector<1x256xf32>
      %15 = arith.mulf %13, %14 : vector<1x256xf32>
      %16 = arith.addf %12, %15 : vector<1x256xf32>
      %c50_i32 = arith.constant 50 : i32
      %17 = tpu.dynamic_rotate %11 by %c50_i32 dim 1 : vector<1x256xf32>, i32 -> vector<1x256xf32>
      %c1 = arith.constant 1 : index
      %c0_14 = arith.constant 0 : index
      %18 = vector.load %arg2[%c1, %c0_14] : memref<49x256xf32, #tpu.memory_space<vmem>>, vector<1x256xf32>
      %19 = arith.mulf %17, %18 : vector<1x256xf32>
      %20 = arith.addf %16, %19 : vector<1x256xf32>
      %c49_i32 = arith.constant 49 : i32
      %21 = tpu.dynamic_rotate %11 by %c49_i32 dim 1 : vector<1x256xf32>, i32 -> vector<1x256xf32>
      %c2 = arith.constant 2 : index
      %c0_15 = arith.constant 0 : index
      %22 = vector.load %arg2[%c2, %c0_15] : memref<49x256xf32, #tpu.memory_space<vmem>>, vector<1x256xf32>
      %23 = arith.mulf %21, %22 : vector<1x256xf32>
      %24 = arith.addf %20, %23 : vector<1x256xf32>
      %c48_i32 = arith.constant 48 : i32
      %25 = tpu.dynamic_rotate %11 by %c48_i32 dim 1 : vector<1x256xf32>, i32 -> vector<1x256xf32>
      %c3 = arith.constant 3 : index
      %c0_16 = arith.constant 0 : index
      %26 = vector.load %arg2[%c3, %c0_16] : memref<49x256xf32, #tpu.memory_space<vmem>>, vector<1x256xf32>
      %27 = arith.mulf %25, %26 : vector<1x256xf32>
      %28 = arith.addf %24, %27 : vector<1x256xf32>
      %c47_i32 = arith.constant 47 : i32
      %29 = tpu.dynamic_rotate %11 by %c47_i32 dim 1 : vector<1x256xf32>, i32 -> vector<1x256xf32>
      %c4 = arith.constant 4 : index
      %c0_17 = arith.constant 0 : index
      %30 = vector.load %arg2[%c4, %c0_17] : memref<49x256xf32, #tpu.memory_space<vmem>>, vector<1x256xf32>
      %31 = arith.mulf %29, %30 : vector<1x256xf32>
      %32 = arith.addf %28, %31 : vector<1x256xf32>
      %c46_i32 = arith.constant 46 : i32
      %33 = tpu.dynamic_rotate %11 by %c46_i32 dim 1 : vector<1x256xf32>, i32 -> vector<1x256xf32>
      %c5 = arith.constant 5 : index
      %c0_18 = arith.constant 0 : index
      %34 = vector.load %arg2[%c5, %c0_18] : memref<49x256xf32, #tpu.memory_space<vmem>>, vector<1x256xf32>
      %35 = arith.mulf %33, %34 : vector<1x256xf32>
      %36 = arith.addf %32, %35 : vector<1x256xf32>
      %c45_i32 = arith.constant 45 : i32
      %37 = tpu.dynamic_rotate %11 by %c45_i32 dim 1 : vector<1x256xf32>, i32 -> vector<1x256xf32>
      %c6 = arith.constant 6 : index
      %c0_19 = arith.constant 0 : index
      %38 = vector.load %arg2[%c6, %c0_19] : memref<49x256xf32, #tpu.memory_space<vmem>>, vector<1x256xf32>
      %39 = arith.mulf %37, %38 : vector<1x256xf32>
      %40 = arith.addf %36, %39 : vector<1x256xf32>
      %c35_i32 = arith.constant 35 : i32
      %41 = tpu.dynamic_rotate %11 by %c35_i32 dim 1 : vector<1x256xf32>, i32 -> vector<1x256xf32>
      %c7 = arith.constant 7 : index
      %c0_20 = arith.constant 0 : index
      %42 = vector.load %arg2[%c7, %c0_20] : memref<49x256xf32, #tpu.memory_space<vmem>>, vector<1x256xf32>
      %43 = arith.mulf %41, %42 : vector<1x256xf32>
      %44 = arith.addf %40, %43 : vector<1x256xf32>
      %c34_i32 = arith.constant 34 : i32
      %45 = tpu.dynamic_rotate %11 by %c34_i32 dim 1 : vector<1x256xf32>, i32 -> vector<1x256xf32>
      %c8 = arith.constant 8 : index
      %c0_21 = arith.constant 0 : index
      %46 = vector.load %arg2[%c8, %c0_21] : memref<49x256xf32, #tpu.memory_space<vmem>>, vector<1x256xf32>
      %47 = arith.mulf %45, %46 : vector<1x256xf32>
      %48 = arith.addf %44, %47 : vector<1x256xf32>
      %c33_i32 = arith.constant 33 : i32
      %49 = tpu.dynamic_rotate %11 by %c33_i32 dim 1 : vector<1x256xf32>, i32 -> vector<1x256xf32>
      %c9 = arith.constant 9 : index
      %c0_22 = arith.constant 0 : index
      %50 = vector.load %arg2[%c9, %c0_22] : memref<49x256xf32, #tpu.memory_space<vmem>>, vector<1x256xf32>
      %51 = arith.mulf %49, %50 : vector<1x256xf32>
      %52 = arith.addf %48, %51 : vector<1x256xf32>
      %c32_i32 = arith.constant 32 : i32
      %53 = tpu.dynamic_rotate %11 by %c32_i32 dim 1 : vector<1x256xf32>, i32 -> vector<1x256xf32>
      %c10 = arith.constant 10 : index
      %c0_23 = arith.constant 0 : index
      %54 = vector.load %arg2[%c10, %c0_23] : memref<49x256xf32, #tpu.memory_space<vmem>>, vector<1x256xf32>
      %55 = arith.mulf %53, %54 : vector<1x256xf32>
      %56 = arith.addf %52, %55 : vector<1x256xf32>
      %c31_i32 = arith.constant 31 : i32
      %57 = tpu.dynamic_rotate %11 by %c31_i32 dim 1 : vector<1x256xf32>, i32 -> vector<1x256xf32>
      %c11 = arith.constant 11 : index
      %c0_24 = arith.constant 0 : index
      %58 = vector.load %arg2[%c11, %c0_24] : memref<49x256xf32, #tpu.memory_space<vmem>>, vector<1x256xf32>
      %59 = arith.mulf %57, %58 : vector<1x256xf32>
      %60 = arith.addf %56, %59 : vector<1x256xf32>
      %c30_i32 = arith.constant 30 : i32
      %61 = tpu.dynamic_rotate %11 by %c30_i32 dim 1 : vector<1x256xf32>, i32 -> vector<1x256xf32>
      %c12 = arith.constant 12 : index
      %c0_25 = arith.constant 0 : index
      %62 = vector.load %arg2[%c12, %c0_25] : memref<49x256xf32, #tpu.memory_space<vmem>>, vector<1x256xf32>
      %63 = arith.mulf %61, %62 : vector<1x256xf32>
      %64 = arith.addf %60, %63 : vector<1x256xf32>
      %c29_i32 = arith.constant 29 : i32
      %65 = tpu.dynamic_rotate %11 by %c29_i32 dim 1 : vector<1x256xf32>, i32 -> vector<1x256xf32>
      %c13 = arith.constant 13 : index
      %c0_26 = arith.constant 0 : index
      %66 = vector.load %arg2[%c13, %c0_26] : memref<49x256xf32, #tpu.memory_space<vmem>>, vector<1x256xf32>
      %67 = arith.mulf %65, %66 : vector<1x256xf32>
      %68 = arith.addf %64, %67 : vector<1x256xf32>
      %c19_i32 = arith.constant 19 : i32
      %69 = tpu.dynamic_rotate %11 by %c19_i32 dim 1 : vector<1x256xf32>, i32 -> vector<1x256xf32>
      %c14 = arith.constant 14 : index
      %c0_27 = arith.constant 0 : index
      %70 = vector.load %arg2[%c14, %c0_27] : memref<49x256xf32, #tpu.memory_space<vmem>>, vector<1x256xf32>
      %71 = arith.mulf %69, %70 : vector<1x256xf32>
      %72 = arith.addf %68, %71 : vector<1x256xf32>
      %c18_i32 = arith.constant 18 : i32
      %73 = tpu.dynamic_rotate %11 by %c18_i32 dim 1 : vector<1x256xf32>, i32 -> vector<1x256xf32>
      %c15 = arith.constant 15 : index
      %c0_28 = arith.constant 0 : index
      %74 = vector.load %arg2[%c15, %c0_28] : memref<49x256xf32, #tpu.memory_space<vmem>>, vector<1x256xf32>
      %75 = arith.mulf %73, %74 : vector<1x256xf32>
      %76 = arith.addf %72, %75 : vector<1x256xf32>
      %c17_i32 = arith.constant 17 : i32
      %77 = tpu.dynamic_rotate %11 by %c17_i32 dim 1 : vector<1x256xf32>, i32 -> vector<1x256xf32>
      %c16 = arith.constant 16 : index
      %c0_29 = arith.constant 0 : index
      %78 = vector.load %arg2[%c16, %c0_29] : memref<49x256xf32, #tpu.memory_space<vmem>>, vector<1x256xf32>
      %79 = arith.mulf %77, %78 : vector<1x256xf32>
      %80 = arith.addf %76, %79 : vector<1x256xf32>
      %c16_i32 = arith.constant 16 : i32
      %81 = tpu.dynamic_rotate %11 by %c16_i32 dim 1 : vector<1x256xf32>, i32 -> vector<1x256xf32>
      %c17 = arith.constant 17 : index
      %c0_30 = arith.constant 0 : index
      %82 = vector.load %arg2[%c17, %c0_30] : memref<49x256xf32, #tpu.memory_space<vmem>>, vector<1x256xf32>
      %83 = arith.mulf %81, %82 : vector<1x256xf32>
      %84 = arith.addf %80, %83 : vector<1x256xf32>
      %c15_i32 = arith.constant 15 : i32
      %85 = tpu.dynamic_rotate %11 by %c15_i32 dim 1 : vector<1x256xf32>, i32 -> vector<1x256xf32>
      %c18 = arith.constant 18 : index
      %c0_31 = arith.constant 0 : index
      %86 = vector.load %arg2[%c18, %c0_31] : memref<49x256xf32, #tpu.memory_space<vmem>>, vector<1x256xf32>
      %87 = arith.mulf %85, %86 : vector<1x256xf32>
      %88 = arith.addf %84, %87 : vector<1x256xf32>
      %c14_i32 = arith.constant 14 : i32
      %89 = tpu.dynamic_rotate %11 by %c14_i32 dim 1 : vector<1x256xf32>, i32 -> vector<1x256xf32>
      %c19 = arith.constant 19 : index
      %c0_32 = arith.constant 0 : index
      %90 = vector.load %arg2[%c19, %c0_32] : memref<49x256xf32, #tpu.memory_space<vmem>>, vector<1x256xf32>
      %91 = arith.mulf %89, %90 : vector<1x256xf32>
      %92 = arith.addf %88, %91 : vector<1x256xf32>
      %c13_i32 = arith.constant 13 : i32
      %93 = tpu.dynamic_rotate %11 by %c13_i32 dim 1 : vector<1x256xf32>, i32 -> vector<1x256xf32>
      %c20 = arith.constant 20 : index
      %c0_33 = arith.constant 0 : index
      %94 = vector.load %arg2[%c20, %c0_33] : memref<49x256xf32, #tpu.memory_space<vmem>>, vector<1x256xf32>
      %95 = arith.mulf %93, %94 : vector<1x256xf32>
      %96 = arith.addf %92, %95 : vector<1x256xf32>
      %c3_i32 = arith.constant 3 : i32
      %97 = tpu.dynamic_rotate %11 by %c3_i32 dim 1 : vector<1x256xf32>, i32 -> vector<1x256xf32>
      %c21 = arith.constant 21 : index
      %c0_34 = arith.constant 0 : index
      %98 = vector.load %arg2[%c21, %c0_34] : memref<49x256xf32, #tpu.memory_space<vmem>>, vector<1x256xf32>
      %99 = arith.mulf %97, %98 : vector<1x256xf32>
      %100 = arith.addf %96, %99 : vector<1x256xf32>
      %c2_i32 = arith.constant 2 : i32
      %101 = tpu.dynamic_rotate %11 by %c2_i32 dim 1 : vector<1x256xf32>, i32 -> vector<1x256xf32>
      %c22 = arith.constant 22 : index
      %c0_35 = arith.constant 0 : index
      %102 = vector.load %arg2[%c22, %c0_35] : memref<49x256xf32, #tpu.memory_space<vmem>>, vector<1x256xf32>
      %103 = arith.mulf %101, %102 : vector<1x256xf32>
      %104 = arith.addf %100, %103 : vector<1x256xf32>
      %c1_i32 = arith.constant 1 : i32
      %105 = tpu.dynamic_rotate %11 by %c1_i32 dim 1 : vector<1x256xf32>, i32 -> vector<1x256xf32>
      %c23 = arith.constant 23 : index
      %c0_36 = arith.constant 0 : index
      %106 = vector.load %arg2[%c23, %c0_36] : memref<49x256xf32, #tpu.memory_space<vmem>>, vector<1x256xf32>
      %107 = arith.mulf %105, %106 : vector<1x256xf32>
      %108 = arith.addf %104, %107 : vector<1x256xf32>
      %c24 = arith.constant 24 : index
      %c0_37 = arith.constant 0 : index
      %109 = vector.load %arg2[%c24, %c0_37] : memref<49x256xf32, #tpu.memory_space<vmem>>, vector<1x256xf32>
      %110 = arith.mulf %11, %109 : vector<1x256xf32>
      %111 = arith.addf %108, %110 : vector<1x256xf32>
      %c255_i32 = arith.constant 255 : i32
      %112 = tpu.dynamic_rotate %11 by %c255_i32 dim 1 : vector<1x256xf32>, i32 -> vector<1x256xf32>
      %c25 = arith.constant 25 : index
      %c0_38 = arith.constant 0 : index
      %113 = vector.load %arg2[%c25, %c0_38] : memref<49x256xf32, #tpu.memory_space<vmem>>, vector<1x256xf32>
      %114 = arith.mulf %112, %113 : vector<1x256xf32>
      %115 = arith.addf %111, %114 : vector<1x256xf32>
      %c254_i32 = arith.constant 254 : i32
      %116 = tpu.dynamic_rotate %11 by %c254_i32 dim 1 : vector<1x256xf32>, i32 -> vector<1x256xf32>
      %c26 = arith.constant 26 : index
      %c0_39 = arith.constant 0 : index
      %117 = vector.load %arg2[%c26, %c0_39] : memref<49x256xf32, #tpu.memory_space<vmem>>, vector<1x256xf32>
      %118 = arith.mulf %116, %117 : vector<1x256xf32>
      %119 = arith.addf %115, %118 : vector<1x256xf32>
      %c253_i32 = arith.constant 253 : i32
      %120 = tpu.dynamic_rotate %11 by %c253_i32 dim 1 : vector<1x256xf32>, i32 -> vector<1x256xf32>
      %c27 = arith.constant 27 : index
      %c0_40 = arith.constant 0 : index
      %121 = vector.load %arg2[%c27, %c0_40] : memref<49x256xf32, #tpu.memory_space<vmem>>, vector<1x256xf32>
      %122 = arith.mulf %120, %121 : vector<1x256xf32>
      %123 = arith.addf %119, %122 : vector<1x256xf32>
      %c243_i32 = arith.constant 243 : i32
      %124 = tpu.dynamic_rotate %11 by %c243_i32 dim 1 : vector<1x256xf32>, i32 -> vector<1x256xf32>
      %c28 = arith.constant 28 : index
      %c0_41 = arith.constant 0 : index
      %125 = vector.load %arg2[%c28, %c0_41] : memref<49x256xf32, #tpu.memory_space<vmem>>, vector<1x256xf32>
      %126 = arith.mulf %124, %125 : vector<1x256xf32>
      %127 = arith.addf %123, %126 : vector<1x256xf32>
      %c242_i32 = arith.constant 242 : i32
      %128 = tpu.dynamic_rotate %11 by %c242_i32 dim 1 : vector<1x256xf32>, i32 -> vector<1x256xf32>
      %c29 = arith.constant 29 : index
      %c0_42 = arith.constant 0 : index
      %129 = vector.load %arg2[%c29, %c0_42] : memref<49x256xf32, #tpu.memory_space<vmem>>, vector<1x256xf32>
      %130 = arith.mulf %128, %129 : vector<1x256xf32>
      %131 = arith.addf %127, %130 : vector<1x256xf32>
      %c241_i32 = arith.constant 241 : i32
      %132 = tpu.dynamic_rotate %11 by %c241_i32 dim 1 : vector<1x256xf32>, i32 -> vector<1x256xf32>
      %c30 = arith.constant 30 : index
      %c0_43 = arith.constant 0 : index
      %133 = vector.load %arg2[%c30, %c0_43] : memref<49x256xf32, #tpu.memory_space<vmem>>, vector<1x256xf32>
      %134 = arith.mulf %132, %133 : vector<1x256xf32>
      %135 = arith.addf %131, %134 : vector<1x256xf32>
      %c240_i32 = arith.constant 240 : i32
      %136 = tpu.dynamic_rotate %11 by %c240_i32 dim 1 : vector<1x256xf32>, i32 -> vector<1x256xf32>
      %c31 = arith.constant 31 : index
      %c0_44 = arith.constant 0 : index
      %137 = vector.load %arg2[%c31, %c0_44] : memref<49x256xf32, #tpu.memory_space<vmem>>, vector<1x256xf32>
      %138 = arith.mulf %136, %137 : vector<1x256xf32>
      %139 = arith.addf %135, %138 : vector<1x256xf32>
      %c239_i32 = arith.constant 239 : i32
      %140 = tpu.dynamic_rotate %11 by %c239_i32 dim 1 : vector<1x256xf32>, i32 -> vector<1x256xf32>
      %c32 = arith.constant 32 : index
      %c0_45 = arith.constant 0 : index
      %141 = vector.load %arg2[%c32, %c0_45] : memref<49x256xf32, #tpu.memory_space<vmem>>, vector<1x256xf32>
      %142 = arith.mulf %140, %141 : vector<1x256xf32>
      %143 = arith.addf %139, %142 : vector<1x256xf32>
      %c238_i32 = arith.constant 238 : i32
      %144 = tpu.dynamic_rotate %11 by %c238_i32 dim 1 : vector<1x256xf32>, i32 -> vector<1x256xf32>
      %c33 = arith.constant 33 : index
      %c0_46 = arith.constant 0 : index
      %145 = vector.load %arg2[%c33, %c0_46] : memref<49x256xf32, #tpu.memory_space<vmem>>, vector<1x256xf32>
      %146 = arith.mulf %144, %145 : vector<1x256xf32>
      %147 = arith.addf %143, %146 : vector<1x256xf32>
      %c237_i32 = arith.constant 237 : i32
      %148 = tpu.dynamic_rotate %11 by %c237_i32 dim 1 : vector<1x256xf32>, i32 -> vector<1x256xf32>
      %c34 = arith.constant 34 : index
      %c0_47 = arith.constant 0 : index
      %149 = vector.load %arg2[%c34, %c0_47] : memref<49x256xf32, #tpu.memory_space<vmem>>, vector<1x256xf32>
      %150 = arith.mulf %148, %149 : vector<1x256xf32>
      %151 = arith.addf %147, %150 : vector<1x256xf32>
      %c227_i32 = arith.constant 227 : i32
      %152 = tpu.dynamic_rotate %11 by %c227_i32 dim 1 : vector<1x256xf32>, i32 -> vector<1x256xf32>
      %c35 = arith.constant 35 : index
      %c0_48 = arith.constant 0 : index
      %153 = vector.load %arg2[%c35, %c0_48] : memref<49x256xf32, #tpu.memory_space<vmem>>, vector<1x256xf32>
      %154 = arith.mulf %152, %153 : vector<1x256xf32>
      %155 = arith.addf %151, %154 : vector<1x256xf32>
      %c226_i32 = arith.constant 226 : i32
      %156 = tpu.dynamic_rotate %11 by %c226_i32 dim 1 : vector<1x256xf32>, i32 -> vector<1x256xf32>
      %c36 = arith.constant 36 : index
      %c0_49 = arith.constant 0 : index
      %157 = vector.load %arg2[%c36, %c0_49] : memref<49x256xf32, #tpu.memory_space<vmem>>, vector<1x256xf32>
      %158 = arith.mulf %156, %157 : vector<1x256xf32>
      %159 = arith.addf %155, %158 : vector<1x256xf32>
      %c225_i32 = arith.constant 225 : i32
      %160 = tpu.dynamic_rotate %11 by %c225_i32 dim 1 : vector<1x256xf32>, i32 -> vector<1x256xf32>
      %c37 = arith.constant 37 : index
      %c0_50 = arith.constant 0 : index
      %161 = vector.load %arg2[%c37, %c0_50] : memref<49x256xf32, #tpu.memory_space<vmem>>, vector<1x256xf32>
      %162 = arith.mulf %160, %161 : vector<1x256xf32>
      %163 = arith.addf %159, %162 : vector<1x256xf32>
      %c224_i32 = arith.constant 224 : i32
      %164 = tpu.dynamic_rotate %11 by %c224_i32 dim 1 : vector<1x256xf32>, i32 -> vector<1x256xf32>
      %c38 = arith.constant 38 : index
      %c0_51 = arith.constant 0 : index
      %165 = vector.load %arg2[%c38, %c0_51] : memref<49x256xf32, #tpu.memory_space<vmem>>, vector<1x256xf32>
      %166 = arith.mulf %164, %165 : vector<1x256xf32>
      %167 = arith.addf %163, %166 : vector<1x256xf32>
      %c223_i32 = arith.constant 223 : i32
      %168 = tpu.dynamic_rotate %11 by %c223_i32 dim 1 : vector<1x256xf32>, i32 -> vector<1x256xf32>
      %c39 = arith.constant 39 : index
      %c0_52 = arith.constant 0 : index
      %169 = vector.load %arg2[%c39, %c0_52] : memref<49x256xf32, #tpu.memory_space<vmem>>, vector<1x256xf32>
      %170 = arith.mulf %168, %169 : vector<1x256xf32>
      %171 = arith.addf %167, %170 : vector<1x256xf32>
      %c222_i32 = arith.constant 222 : i32
      %172 = tpu.dynamic_rotate %11 by %c222_i32 dim 1 : vector<1x256xf32>, i32 -> vector<1x256xf32>
      %c40 = arith.constant 40 : index
      %c0_53 = arith.constant 0 : index
      %173 = vector.load %arg2[%c40, %c0_53] : memref<49x256xf32, #tpu.memory_space<vmem>>, vector<1x256xf32>
      %174 = arith.mulf %172, %173 : vector<1x256xf32>
      %175 = arith.addf %171, %174 : vector<1x256xf32>
      %c221_i32 = arith.constant 221 : i32
      %176 = tpu.dynamic_rotate %11 by %c221_i32 dim 1 : vector<1x256xf32>, i32 -> vector<1x256xf32>
      %c41 = arith.constant 41 : index
      %c0_54 = arith.constant 0 : index
      %177 = vector.load %arg2[%c41, %c0_54] : memref<49x256xf32, #tpu.memory_space<vmem>>, vector<1x256xf32>
      %178 = arith.mulf %176, %177 : vector<1x256xf32>
      %179 = arith.addf %175, %178 : vector<1x256xf32>
      %c211_i32 = arith.constant 211 : i32
      %180 = tpu.dynamic_rotate %11 by %c211_i32 dim 1 : vector<1x256xf32>, i32 -> vector<1x256xf32>
      %c42 = arith.constant 42 : index
      %c0_55 = arith.constant 0 : index
      %181 = vector.load %arg2[%c42, %c0_55] : memref<49x256xf32, #tpu.memory_space<vmem>>, vector<1x256xf32>
      %182 = arith.mulf %180, %181 : vector<1x256xf32>
      %183 = arith.addf %179, %182 : vector<1x256xf32>
      %c210_i32 = arith.constant 210 : i32
      %184 = tpu.dynamic_rotate %11 by %c210_i32 dim 1 : vector<1x256xf32>, i32 -> vector<1x256xf32>
      %c43 = arith.constant 43 : index
      %c0_56 = arith.constant 0 : index
      %185 = vector.load %arg2[%c43, %c0_56] : memref<49x256xf32, #tpu.memory_space<vmem>>, vector<1x256xf32>
      %186 = arith.mulf %184, %185 : vector<1x256xf32>
      %187 = arith.addf %183, %186 : vector<1x256xf32>
      %c209_i32 = arith.constant 209 : i32
      %188 = tpu.dynamic_rotate %11 by %c209_i32 dim 1 : vector<1x256xf32>, i32 -> vector<1x256xf32>
      %c44 = arith.constant 44 : index
      %c0_57 = arith.constant 0 : index
      %189 = vector.load %arg2[%c44, %c0_57] : memref<49x256xf32, #tpu.memory_space<vmem>>, vector<1x256xf32>
      %190 = arith.mulf %188, %189 : vector<1x256xf32>
      %191 = arith.addf %187, %190 : vector<1x256xf32>
      %c208_i32 = arith.constant 208 : i32
      %192 = tpu.dynamic_rotate %11 by %c208_i32 dim 1 : vector<1x256xf32>, i32 -> vector<1x256xf32>
      %c45 = arith.constant 45 : index
      %c0_58 = arith.constant 0 : index
      %193 = vector.load %arg2[%c45, %c0_58] : memref<49x256xf32, #tpu.memory_space<vmem>>, vector<1x256xf32>
      %194 = arith.mulf %192, %193 : vector<1x256xf32>
      %195 = arith.addf %191, %194 : vector<1x256xf32>
      %c207_i32 = arith.constant 207 : i32
      %196 = tpu.dynamic_rotate %11 by %c207_i32 dim 1 : vector<1x256xf32>, i32 -> vector<1x256xf32>
      %c46 = arith.constant 46 : index
      %c0_59 = arith.constant 0 : index
      %197 = vector.load %arg2[%c46, %c0_59] : memref<49x256xf32, #tpu.memory_space<vmem>>, vector<1x256xf32>
      %198 = arith.mulf %196, %197 : vector<1x256xf32>
      %199 = arith.addf %195, %198 : vector<1x256xf32>
      %c206_i32 = arith.constant 206 : i32
      %200 = tpu.dynamic_rotate %11 by %c206_i32 dim 1 : vector<1x256xf32>, i32 -> vector<1x256xf32>
      %c47 = arith.constant 47 : index
      %c0_60 = arith.constant 0 : index
      %201 = vector.load %arg2[%c47, %c0_60] : memref<49x256xf32, #tpu.memory_space<vmem>>, vector<1x256xf32>
      %202 = arith.mulf %200, %201 : vector<1x256xf32>
      %203 = arith.addf %199, %202 : vector<1x256xf32>
      %c205_i32 = arith.constant 205 : i32
      %204 = tpu.dynamic_rotate %11 by %c205_i32 dim 1 : vector<1x256xf32>, i32 -> vector<1x256xf32>
      %c48 = arith.constant 48 : index
      %c0_61 = arith.constant 0 : index
      %205 = vector.load %arg2[%c48, %c0_61] : memref<49x256xf32, #tpu.memory_space<vmem>>, vector<1x256xf32>
      %206 = arith.mulf %204, %205 : vector<1x256xf32>
      %207 = arith.addf %203, %206 : vector<1x256xf32>
      %208 = arith.negf %207 : vector<1x256xf32>
      %209 = math.exp %208 : vector<1x256xf32>
      %cst_62 = arith.constant 1.000000e+00 : f32
      %210 = vector.broadcast %cst_62 : f32 to vector<1x256xf32>
      %211 = arith.addf %210, %209 : vector<1x256xf32>
      %212 = arith.divf %210, %211 : vector<1x256xf32>
      %213 = vector.shape_cast %212 : vector<1x256xf32> to vector<1x1x256xf32>
      %c0_63 = arith.constant 0 : index
      %c0_64 = arith.constant 0 : index
      %c0_65 = arith.constant 0 : index
      %214 = vector.load %arg4[%c0_63, %c0_64, %c0_65] : memref<1x1x256xf32, #tpu.memory_space<vmem>>, vector<1x1x256xf32>
      tpu.vector_store %arg4[%c0_63, %c0_64, %c0_65], %213 {strides = array<i32>} : memref<1x1x256xf32, #tpu.memory_space<vmem>>, vector<1x1x256xf32>,
    } else {
    }
    return
  }
  func.func @transform_0(%arg0: i32, %arg1: i32) -> (i32, i32) {
    %c0_i32 = arith.constant 0 : i32
    %c0_i32_0 = arith.constant 0 : i32
    %c0_i32_1 = arith.constant 0 : i32
    return %c0_i32, %c0_i32_0 : i32, i32
  }
  func.func @transform_1(%arg0: i32, %arg1: i32) -> (i32, i32, i32) {
    %c0_i32 = arith.constant 0 : i32
    %c0_i32_0 = arith.constant 0 : i32
    return %arg0, %arg1, %c0_i32 : i32, i32, i32
  }
  func.func @transform_2(%arg0: i32, %arg1: i32) -> (i32, i32, i32) {
    %c0_i32 = arith.constant 0 : i32
    %c0_i32_0 = arith.constant 0 : i32
    %c0_i32_1 = arith.constant 0 : i32
    return %arg0, %c0_i32, %c0_i32_0 : i32, i32, i32
  }
}

</mosaic_0001>

<bundles_post_ra>
// kernel: tpu_custom_call.1
= control target key start
LH: loop header
LB: loop body
LE: loop exit
PB: predicated region body
PF: predicated region fallthrough
CT: control target
= control target key end

     0   :  { %7 = vsyncpa [#allocation4], 0  ;;  %s2851_s0 = inlined_call_operand.hbm [shape: f32[49,256], index: 0, kind: input, shape index: {}]   ;;  %s2852_s1 = inlined_call_operand.hbm [shape: f32[2,4,256], index: 1, kind: input, shape index: {}]   ;;  %s2853_s2 = inlined_call_operand.hbm [shape: f32[2,1,256], index: 2, kind: output, shape index: {}]  }
   0x1   :  { %8 = vsyncpa [#allocation7], 0 }
   0x2   :  { %10 = vsyncpa [#allocation7 + $0x1], 0 }
   0x3   :  { %11 = vsyncpa [#allocation5], 0 }
   0x4   :  { %13 = vsyncpa [#allocation5 + $0x1], 0  ;;  %s1938_s9 = smov 0   ;;  %s1940_s10 = smov 0  }
   0x5   :  { %s1942_s11 = smov 0   ;;  %s1944_s12 = smov 0  }
   0x6   :  { %s1946_s13 = smov 0   ;;  %s1948_s14 = smov 0  }
   0x7 LB: > { %s1567_s15 = sadd.s32 4294967295, %s1866_s14   ;;  %s1568_s16 = sadd.s32 4294967294, %s1866_s14   ;;  %s1866_s14 = sphi %s1948_s14, %s19_s14   ;;  %s1862_s13 = sphi %s1946_s13, %s2879_s13   ;;  %s1858_s12 = sphi %s1944_s12, %s2878_s12   ;;  %s1854_s11 = sphi %s1942_s11, %s2877_s11   ;;  %s1850_s10 = sphi %s1940_s10, %s2876_s10   ;;  %s1846_s9 = sphi %s1938_s9, %s2875_s9  }
   0x8   : > { %p74_p0 = scmp.ne.s32.totalorder %s1850_s10, %s1846_s9  ;;  %p1972_p1 = scmp.eq.s32.totalorder %s1567_s15, 0 }
   0x9   : > { %p1976_p2 = scmp.eq.s32.totalorder %s1567_s15, 1  ;;  %p104_p3 = scmp.eq.s32.totalorder %s1568_s16, 1 }
   0xa   : > { %s2858_s17 = scalar_select %p1972_p1, 1, 0 }
   0xb   : > { %s2859_s18 = scalar_select %p1976_p2, 1, 0 }
   0xc   : > { %p1982_p4 = por %p1972_p1, %p74_p0  ;;  %p1569_p5 = scmp.ge.s32.totalorder %s1866_s14, 1 }
   0xd   : > { %p1987_p6 = por %p104_p3, %p74_p0  ;;  %p111_p7 = scmp.lt.s32.totalorder %s1866_s14, 3 }
   0xe   : > { %s2860_s19 = scalar_select %p1982_p4, 1, 0 }
   0xf   : > { %s2861_s20 = scalar_select %p1987_p6, 1, 0 }
  0x10   : > { %p1992_p8 = pnand %p1569_p5, %p111_p7  ;;  %s1868_s22 = smov [#allocation3]  }
  0x11   : > { %s123_s23 = sshll.u32 %s1868_s22, 4  ;;  %s31_s25 = sadd.s32 1, %s1862_s13  ;;  %s124_s23 = int_to_ptr.vmem [resolvable:$true] %s123_s23 }
  0x12   : > { %s2862_s21 = scalar_select %p1992_p8, 1, 0 }
  0x13   : > { %p1596_p9 = pneg %p1992_p8  ;;  %s1722_s28 = scalar_lea.hbm %s2851_s0, 1792 }
  0x14   : > { %p1723_p12 = scmp.ne.s32.totalorder %s2851_s0, %s1722_s28  ;;  %p1729_p5 = scmp.lt.u32.totalorder %s1722_s28, %s2851_s0 }
  0x15   : > { %p2001_p11 = pnand %p1596_p9, %p1972_p1 }
  0x17   : > { %p1724_p13 = pneg %p2001_p11 }
  0x19   : > { %p1725_p0 = pnand %p1724_p13, %p1723_p12 }
  0x1b   : > { %p1726_p3 = pneg %p1725_p0 }
  0x1d   : > { %p1731_p7 = pnand %p1729_p5, %p1726_p3 }
  0x1f   : > { %1734 = shalt.err (!%p1731_p7)
}
  0x20   : > { %s1735_s5 = scalar_lea.vmem %s124_s23, 1792  ;;  %p1743_p4 = scmp.lt.s32.totalorder %s124_s23, %s124_s23 }
  0x21   : > { %p1736_p9 = scmp.ne.s32.totalorder %s124_s23, %s1735_s5  ;;  %p1744_p1 = scmp.lt.s32.totalorder %s1735_s5, %s1735_s5 }
  0x23   : > { %p1738_p10 = pnand %p1736_p9, %p1724_p13  ;;  %p1745_p8 = por %p1744_p1, %p1743_p4 }
  0x25   : > { %p1739_p6 = pneg %p1738_p10 }
  0x27   : > { %p1746_p2 = pnand %p1745_p8, %p1739_p6 }
  0x29   : > { %1749 = shalt.err (!%p1746_p2)
}
  0x2a   : > { %s1869_s6 = smov 256   ;;  %s1870_s7 = smov 16  }
  0x2b   : > { %1599 = dma.hbm_to_vmem [thread:$0]  (!%p2001_p11), %s2851_s0, 1792, %s124_s23, [#allocation4], %s1869_s6, %s1869_s6, %s1870_s7  }
  0x2c   : > { %p33_p1 = scmp.ge.s32.totalorder %s31_s25, 2  ;;  %s61_s16 = sadd.s32 1, %s1854_s11 }
  0x2d   : > { %p68_p2 = scmp.ne.s32.totalorder %s1854_s11, %s1850_s10  ;;  %p69_p4 = scmp.eq.s32.totalorder %s1866_s14, 0 }
  0x2e   : > { %s2881_s25 = smov (%p33_p1, %s31_s25), 0  ;;  %p2865_p8 = scmp.ne.s32.totalorder %s2859_s18, 0 }
  0x2f   : > { %p2028_p6 = por %p69_p4, %p68_p2  ;;  %s56_s24 = ssub.s32 %s1862_s13, %s2881_s25 }
  0x30   : > { %p2034_p10 = por %p2865_p8, %p68_p2  ;;  %p1609_p12 = scmp.lt.s32.totalorder %s1866_s14, 2 }
  0x31   : > { %p59_p11 = scmp.eq.s32.totalorder %s56_s24, 0  ;;  %s137_s23 = sand.u32 1, %s1854_s11  }
  0x32   : > { %s1572_s27 = sshll.u32 %s137_s23, 3  ;;  %s1586_s29 = sshll.u32 %s1862_s13, 7 }
  0x33   : > { %s2043_s28 = scalar_select %p59_p11, %s1854_s11, %s61_s16  }
  0x34   : > { %s2049_s4 = scalar_lea.hbm %s2852_s1, %s1586_s29  ;;  %s141_s18 = scalar_lea.vmem [#allocation6], %s1572_s27 }
  0x35   : > { %s151_s5 = sshll.u32 %s141_s18, 4  ;;  %p2055_p13 = pnand %p1609_p12, %p2028_p6  ;;  %s2051_s5 = int_to_ptr.vmem [resolvable:$true] %s151_s5 }
  0x36   : > { %s138_s7 = scalar_lea.sflag [#allocation7], %s137_s23  ;;  %s1750_s8 = scalar_lea.hbm %s2049_s4, 128 }
  0x37   : > { %p1751_p0 = scmp.ne.s32.totalorder %s2049_s4, %s1750_s8  ;;  %p1752_p3 = pneg %p2055_p13 }
  0x38   : > { %s1755_s24 = scalar_lea.hbm %s2852_s1, 256  ;;  %p1756_p9 = scmp.lt.u32.totalorder %s2049_s4, %s2852_s1 }
  0x39   : > { %p1753_p5 = pnand %p1752_p3, %p1751_p0  ;;  %p1757_p1 = scmp.lt.u32.totalorder %s1755_s24, %s1750_s8 }
  0x3a   : > { %p1759_p4 = scmp.lt.u32.totalorder %s1750_s8, %s2049_s4 }
  0x3b   : > { %p1754_p7 = pneg %p1753_p5  ;;  %p1758_p2 = por %p1757_p1, %p1756_p9 }
  0x3d   : > { %p1760_p6 = por %p1759_p4, %p1758_p2 }
  0x3f   : > { %p1761_p8 = pnand %p1760_p6, %p1754_p7 }
  0x41   : > { %1764 = shalt.err (!%p1761_p8)
}
  0x42   : > { %s1765_s23 = scalar_lea.vmem %s2051_s5, 128  ;;  %s1871_s29 = smov [#allocation6]  }
  0x43   : > { %p1766_p12 = scmp.ne.s32.totalorder %s2051_s5, %s1765_s23  ;;  %s1770_s30 = sshll.u32 %s1871_s29, 4  ;;  %s1771_s30 = int_to_ptr.vmem [resolvable:$false] %s1770_s30 }
  0x44   : > { %s1772_s3 = scalar_lea.vmem %s1771_s30, 256  ;;  %p1773_p5 = scmp.lt.s32.totalorder %s2051_s5, %s1771_s30 }
  0x45   : > { %p1768_p11 = pnand %p1766_p12, %p1752_p3  ;;  %p1774_p9 = scmp.lt.s32.totalorder %s1772_s3, %s1765_s23 }
  0x47   : > { %p1769_p0 = pneg %p1768_p11  ;;  %p1775_p1 = por %p1774_p9, %p1773_p5 }
  0x49   : > { %p1776_p2 = pnand %p1775_p1, %p1769_p0 }
  0x4b   : > { %1779 = shalt.err (!%p1776_p2)
}
  0x4c   : > { %1603 = dma.hbm_to_vmem [thread:$0]  (!%p2055_p13), %s2049_s4, 128, %s2051_s5, %s138_s7  }
  0x4d   : > { %p2868_p7 = scmp.ne.s32.totalorder %s2862_s21, 0 }
  0x4e   : > { %p2869_p3 = scmp.ne.s32.totalorder (!%p2868_p7), %s2858_s17, 0 }
  0x4f   : > { %160 = sbr.rel (%p2868_p7) target bundleno = 481 (0x1e1), region = 28 }
  0x56   : > { %1833 = dma.done.wait (%p2869_p3), [#allocation4], 1792  }
  0x57   : > { %1835 = vsyncadd (%p2869_p3), [#allocation4], 4294965504  ;;  %s2091_s18 = sand.u32 1, %s1850_s10   ;;  %p2870_p4 = scmp.ne.s32.totalorder %s2860_s19, 0 }
  0x58   : > { %s1577_s8 = sshll.u32 %s2091_s18, 3  ;;  %s167_s6 = scalar_lea.sflag [#allocation7], %s2091_s18 }
  0x59   : > { %s170_s15 = scalar_lea.vmem [#allocation6], %s1577_s8 }
  0x5a   : > { %1837 = dma.done.wait (%p2870_p4), %s167_s6, 128  }
  0x5b   : > { %1839 = vsyncadd (%p2870_p4), %s167_s6, 4294967168  ;;  %v195_v0 = vlaneseq  ;;  %v1872_v2 = vmov -inf   ;;  %vm204_vm1 = vcmask 1043456   ;;  %v200_v3 = vld [vmem:[%s170_s15] sm:$0xff]  ;;  %v1873_v12 = vmov 1966171168  }
  0x5c   : > { %v202_v4 = vcombine.high %v200_v3, %v200_v3  ;;  %v205_v5 = vsel %vm204_vm1, %v200_v3, -inf  ;;  %v224_v13 = vunpack.c.l.s4 %v1873_v12  ;;  %s1874_s17 = smov 50   ;;  %s1875_s19 = smov 51   ;;  %v292_v35 = vld [vmem:[#allocation3 + $0x1] ss:$8 sm:$0x3] }
  0x5d   : > { %vm2100_vm0 = vcmp.lt.s32.totalorder %v195_v0, 256  ;;  %v206_v6 = vrot.slane %v205_v5, 4  ;;  %v227_v19 = vshrl.u32 %v195_v0, 7  ;;  %s1876_s21 = smov 49   ;;  %s1877_s4 = smov 48   ;;  %v2184_v34 = vand.u32 127, %v195_v0 }
  0x5e   : > { %199 = vst.msk [vmem:[#allocation2] sm:$0x3] %vm2100_vm0, %v1872_v2  ;;  %v212_v7 = vsel %vm204_vm1, %v202_v4, -inf  ;;  %v225_v18 = vunpack.c.0.s8 %v224_v13  ;;  %s1878_s5 = smov 47   ;;  %s1879_s7 = smov 46  }
  0x5f   : > { %v207_v8 = vmax.f32 %v205_v5, %v206_v6  ;;  %v213_v9 = vrot.slane %v212_v7, 4  ;;  %v2113_v29 = vsub.s32 0, %v227_v19  ;;  %v2115_v30 = vsub.s32 1, %v227_v19  ;;  %s1880_s16 = smov 45   ;;  %s1881_s24 = smov 35  }
  0x60   : > { %v2107_v23 = vsub.s32 %v225_v18, %v227_v19  ;;  %s1882_s22 = smov 34   ;;  %s1883_s27 = smov 33   ;;  %v268_v36 = vld [vmem:[#allocation3] ss:$8 sm:$0x3]  ;;  %vm288_vm2 = vcmp.lt.s32.totalorder %v2184_v34, 50 }
  0x61   : > { %v208_v10 = vrot.slane %v207_v8, 2  ;;  %v214_v11 = vmax.f32 %v212_v7, %v213_v9  ;;  %s1884_s23 = smov 32   ;;  %s1885_s29 = smov 31   ;;  %v297_v39 = vrot.slane %v292_v35, %v2113_v29  ;;  %v316_v40 = vld [vmem:[#allocation3 + $0x2] ss:$8 sm:$0x3]  ;;  %v301_v41 = vrot.slane %v292_v35, %v2115_v30 }
  0x62   : > { %s1886_s30 = smov 30   ;;  %s1887_s3 = smov 29   ;;  %vm265_vm3 = vcmp.lt.s32.totalorder %v2184_v34, 51  ;;  %v273_v42 = vrot.slane %v268_v36, %v2113_v29  ;;  %v277_v43 = vrot.slane %v268_v36, %v2115_v30  ;;  %vm312_vm4 = vcmp.lt.s32.totalorder %v2184_v34, 49 }
  0x63   : > { %v209_v14 = vmax.f32 %v207_v8, %v208_v10  ;;  %v215_v15 = vrot.slane %v214_v11, 2  ;;  %s1888_s8 = smov 19   ;;  %s1889_s6 = smov 18   ;;  %v321_v46 = vrot.slane %v316_v40, %v2113_v29  ;;  %v325_v47 = vrot.slane %v316_v40, %v2115_v30  ;;  %v340_v56 = vld [vmem:[#allocation3 + $0x3] ss:$8 sm:$0x3] }
  0x64   : > { %s1890_s15 = smov 17   ;;  %vm336_vm5 = vcmp.lt.s32.totalorder %v2184_v34, 48  ;;  %v345_v2 = vrot.slane %v340_v56, %v2113_v29  ;;  %v349_v3 = vrot.slane %v340_v56, %v2115_v30  ;;  %v364_v4 = vld [vmem:[#allocation3 + $0x4] ss:$8 sm:$0x3]  ;;  %vm360_vm6 = vcmp.lt.s32.totalorder %v2184_v34, 47 }
  0x65   : > { %v210_v16 = vrot.slane %v209_v14, 1  ;;  %v216_v17 = vmax.f32 %v214_v11, %v215_v15  ;;  %v219_v26 = vld [vmem:[#allocation2] sm:$0x3]  ;;  %v369_v13 = vrot.slane %v364_v4, %v2113_v29  ;;  %v388_v15 = vld [vmem:[#allocation3 + $0x5] ss:$8 sm:$0x3] }
  0x66   : > { %vm384_vm7 = vcmp.lt.s32.totalorder %v2184_v34, 46  ;;  %vm408_vm8 = vcmp.lt.s32.totalorder %v2184_v34, 45  ;;  %vm432_vm9 = vcmp.lt.s32.totalorder %v2184_v34, 35  ;;  %vm456_vm10 = vcmp.lt.s32.totalorder %v2184_v34, 34 }
  0x67   : > { %v211_v20 = vmax.f32 %v209_v14, %v210_v16  ;;  %v217_v21 = vrot.slane %v216_v17, 1  ;;  %v373_v14 = vrot.slane %v364_v4, %v2115_v30  ;;  %vm480_vm11 = vcmp.lt.s32.totalorder %v2184_v34, 33 }
  0x68   : > { %vm504_vm12 = vcmp.lt.s32.totalorder %v2184_v34, 32  ;;  %vm528_vm13 = vcmp.lt.s32.totalorder %v2184_v34, 31  ;;  %vm552_vm14 = vcmp.lt.s32.totalorder %v2184_v34, 30  ;;  %vm576_vm15 = vcmp.lt.s32.totalorder %v2184_v34, 29 }
  0x69   : > { %v218_v22 = vmax.f32 %v216_v17, %v217_v21  ;;  %vm600_vm1 = vcmp.lt.s32.totalorder %v2184_v34, 19 }
  0x6b   : > { %v222_v24 = vcombine.low %v211_v20, %v218_v22 }
  0x6d   : > { %v229_v25 = vrot.slane %v222_v24, %v2107_v23 }
  0x6f   : > { %v236_v27 = vrot.slane %v229_v25, %v2107_v23  ;;  %v393_v25 = vrot.slane %v388_v15, %v2113_v29 }
  0x71   : > { %v238_v28 = vmax.f32 %v219_v26, %v236_v27  ;;  %v397_v26 = vrot.slane %v388_v15, %v2115_v30  ;;  %v412_v27 = vld [vmem:[#allocation3 + $0x6] ss:$8 sm:$0x3] }
  0x73   : > { %243 = vst.msk [vmem:[#allocation2] sm:$0x3] %vm2100_vm0, %v238_v28 }
  0x7a   : > { %v2117_v31 = vld [vmem:[#allocation2] sm:$0x3] }
  0x7b   : > { %v2121_v32 = vrot.slane %v2117_v31, %v2113_v29  ;;  %v2125_v33 = vrot.slane %v2117_v31, %v2115_v30 }
  0x7d   : > { %284 = vrot.lane.b32.xlu1 %v2121_v32, %s1874_s17  ;;  %259 = vrot.lane.b32.xlu0 %v2121_v32, %s1875_s19 }
  0x81   : > { %286 = vrot.lane.b32.xlu1 %v2125_v33, %s1874_s17  ;;  %261 = vrot.lane.b32.xlu0 %v2125_v33, %s1875_s19  ;;  %s1891_s17 = smov 16   ;;  %s1892_s19 = smov 15  }
  0x85   : > { %310 = vrot.lane.b32.xlu1 %v2125_v33, %s1876_s21  ;;  %308 = vrot.lane.b32.xlu0 %v2121_v32, %s1876_s21  ;;  %s1893_s21 = smov 14  }
  0x89   : > { %334 = vrot.lane.b32.xlu1 %v2125_v33, %s1877_s4  ;;  %332 = vrot.lane.b32.xlu0 %v2121_v32, %s1877_s4  ;;  %s1894_s4 = smov 13  }
  0x8d   : > { %358 = vrot.lane.b32.xlu1 %v2125_v33, %s1878_s5  ;;  %356 = vrot.lane.b32.xlu0 %v2121_v32, %s1878_s5  ;;  %s1895_s5 = smov 3  }
  0x91   : > { %382 = vrot.lane.b32.xlu1 %v2125_v33, %s1879_s7  ;;  %380 = vrot.lane.b32.xlu0 %v2121_v32, %s1879_s7  ;;  %s1896_s7 = smov 2  }
  0x95   : > { %406 = vrot.lane.b32.xlu1 %v2125_v33, %s1880_s16  ;;  %404 = vrot.lane.b32.xlu0 %v2121_v32, %s1880_s16  ;;  %s1897_s16 = smov 1  }
  0x99   : > { %430 = vrot.lane.b32.xlu1 %v2125_v33, %s1881_s24  ;;  %428 = vrot.lane.b32.xlu0 %v2121_v32, %s1881_s24  ;;  %s1898_s24 = smov 127  }
  0x9d   : > { %454 = vrot.lane.b32.xlu1 %v2125_v33, %s1882_s22  ;;  %452 = vrot.lane.b32.xlu0 %v2121_v32, %s1882_s22  ;;  %s1899_s22 = smov 126  }
  0xa1   : > { %478 = vrot.lane.b32.xlu1 %v2125_v33, %s1883_s27  ;;  %476 = vrot.lane.b32.xlu0 %v2121_v32, %s1883_s27  ;;  %s1900_s27 = smov 125  }
  0xa5   : > { %502 = vrot.lane.b32.xlu1 %v2125_v33, %s1884_s23  ;;  %500 = vrot.lane.b32.xlu0 %v2121_v32, %s1884_s23  ;;  %s1901_s23 = smov 115  }
  0xa9   : > { %526 = vrot.lane.b32.xlu1 %v2125_v33, %s1885_s29  ;;  %524 = vrot.lane.b32.xlu0 %v2121_v32, %s1885_s29  ;;  %s1902_s29 = smov 114  }
  0xad   : > { %550 = vrot.lane.b32.xlu1 %v2125_v33, %s1886_s30  ;;  %548 = vrot.lane.b32.xlu0 %v2121_v32, %s1886_s30  ;;  %s1903_s30 = smov 113  }
  0xb1   : > { %574 = vrot.lane.b32.xlu1 %v2125_v33, %s1887_s3  ;;  %572 = vrot.lane.b32.xlu0 %v2121_v32, %s1887_s3  ;;  %s1904_s3 = smov 112  }
  0xb5   : > { %598 = vrot.lane.b32.xlu1 %v2125_v33, %s1888_s8  ;;  %596 = vrot.lane.b32.xlu0 %v2121_v32, %s1888_s8  ;;  %s1905_s8 = smov 111  }
  0xb9   : > { %622 = vrot.lane.b32.xlu1 %v2125_v33, %s1889_s6  ;;  %620 = vrot.lane.b32.xlu0 %v2121_v32, %s1889_s6  ;;  %s1906_s6 = smov 110  }
  0xbd   : > { %646 = vrot.lane.b32.xlu1 %v2125_v33, %s1890_s15  ;;  %644 = vrot.lane.b32.xlu0 %v2121_v32, %s1890_s15  ;;  %s1907_s15 = smov 109  }
  0xc1   : > { %670 = vrot.lane.b32.xlu1 %v2125_v33, %s1891_s17  ;;  %668 = vrot.lane.b32.xlu0 %v2121_v32, %s1891_s17  ;;  %s1908_s17 = smov 99  }
  0xc5   : > { %694 = vrot.lane.b32.xlu1 %v2125_v33, %s1892_s19  ;;  %692 = vrot.lane.b32.xlu0 %v2121_v32, %s1892_s19  ;;  %s1909_s19 = smov 98  }
  0xc9   : > { %718 = vrot.lane.b32.xlu1 %v2125_v33, %s1893_s21  ;;  %716 = vrot.lane.b32.xlu0 %v2121_v32, %s1893_s21  ;;  %s1910_s21 = smov 97  }
  0xcd   : > { %742 = vrot.lane.b32.xlu1 %v2125_v33, %s1894_s4  ;;  %740 = vrot.lane.b32.xlu0 %v2121_v32, %s1894_s4  ;;  %s1911_s4 = smov 96  }
  0xd1   : > { %766 = vrot.lane.b32.xlu1 %v2125_v33, %s1895_s5  ;;  %764 = vrot.lane.b32.xlu0 %v2121_v32, %s1895_s5  ;;  %s1912_s5 = smov 95  }
  0xd5   : > { %790 = vrot.lane.b32.xlu1 %v2125_v33, %s1896_s7  ;;  %788 = vrot.lane.b32.xlu0 %v2121_v32, %s1896_s7  ;;  %s1913_s7 = smov 94  }
  0xd9   : > { %814 = vrot.lane.b32.xlu1 %v2125_v33, %s1897_s16  ;;  %812 = vrot.lane.b32.xlu0 %v2121_v32, %s1897_s16  ;;  %s1914_s16 = smov 93  }
  0xdd   : > { %854 = vrot.lane.b32.xlu1 %v2125_v33, %s1898_s24  ;;  %852 = vrot.lane.b32.xlu0 %v2121_v32, %s1898_s24  ;;  %s1915_s24 = smov 83  }
  0xe1   : > { %878 = vrot.lane.b32.xlu1 %v2125_v33, %s1899_s22  ;;  %876 = vrot.lane.b32.xlu0 %v2121_v32, %s1899_s22  ;;  %s1916_s22 = smov 82  }
  0xe5   : > { %902 = vrot.lane.b32.xlu1 %v2125_v33, %s1900_s27  ;;  %900 = vrot.lane.b32.xlu0 %v2121_v32, %s1900_s27  ;;  %s1917_s27 = smov 81  }
  0xe9   : > { %926 = vrot.lane.b32.xlu1 %v2125_v33, %s1901_s23  ;;  %924 = vrot.lane.b32.xlu0 %v2121_v32, %s1901_s23  ;;  %s1918_s23 = smov 80  }
  0xed   : > { %950 = vrot.lane.b32.xlu1 %v2125_v33, %s1902_s29  ;;  %948 = vrot.lane.b32.xlu0 %v2121_v32, %s1902_s29  ;;  %s1919_s29 = smov 79  }
  0xef   : > { %v285_v37 = vpop.permute.xlu1 %284  ;;  %v260_v38 = vpop.permute.xlu0 %259 }
  0xf1   : > { %974 = vrot.lane.b32.xlu1 %v2125_v33, %s1903_s30  ;;  %972 = vrot.lane.b32.xlu0 %v2121_v32, %s1903_s30  ;;  %s1920_s30 = smov 78  }
  0xf3   : > { %v287_v44 = vpop.permute.xlu1 %286  ;;  %v262_v45 = vpop.permute.xlu0 %261 }
  0xf4   : > { %v289_v48 = vsel %vm288_vm2, %v285_v37, %v287_v44  ;;  %v290_v49 = vsel %vm288_vm2, %v287_v44, %v285_v37  ;;  %v266_v50 = vsel %vm265_vm3, %v260_v38, %v262_v45  ;;  %v267_v51 = vsel %vm265_vm3, %v262_v45, %v260_v38  ;;  %v436_v44 = vld [vmem:[#allocation3 + $0x7] ss:$8 sm:$0x3] }
  0xf5   : > { %v304_v52 = vmul.f32 %v297_v39, %v290_v49  ;;  %v305_v53 = vmul.f32 %v301_v41, %v289_v48  ;;  %v280_v54 = vmul.f32 %v273_v42, %v267_v51  ;;  %v281_v55 = vmul.f32 %v277_v43, %v266_v50  ;;  %998 = vrot.lane.b32.xlu1 %v2125_v33, %s1904_s3 }
  0xf6   : > { %996 = vrot.lane.b32.xlu0 %v2121_v32, %s1904_s3  ;;  %v417_v42 = vrot.slane %v412_v27, %v2113_v29  ;;  %v421_v43 = vrot.slane %v412_v27, %v2115_v30  ;;  %s1921_s3 = smov 77   ;;  %vm624_vm2 = vcmp.lt.s32.totalorder %v2184_v34, 18  ;;  %vm648_vm3 = vcmp.lt.s32.totalorder %v2184_v34, 17 }
  0xf7   : > { %v306_v57 = vadd.f32 %v304_v52, %v280_v54  ;;  %v307_v58 = vadd.f32 %v305_v53, %v281_v55  ;;  %v311_v59 = vpop.permute.xlu1 %310  ;;  %v309_v60 = vpop.permute.xlu0 %308  ;;  %v441_v53 = vrot.slane %v436_v44, %v2113_v29  ;;  %v445_v54 = vrot.slane %v436_v44, %v2115_v30  ;;  %v460_v55 = vld [vmem:[#allocation3 + $0x10] ss:$8 sm:$0x3] }
  0xf8   : > { %v313_v61 = vsel %vm312_vm4, %v309_v60, %v311_v59  ;;  %v314_v62 = vsel %vm312_vm4, %v311_v59, %v309_v60  ;;  %vm672_vm4 = vcmp.lt.s32.totalorder %v2184_v34, 16 }
  0xf9   : > { %v328_v63 = vmul.f32 %v321_v46, %v314_v62  ;;  %v329_v0 = vmul.f32 %v325_v47, %v313_v61  ;;  %1022 = vrot.lane.b32.xlu1 %v2125_v33, %s1905_s8 }
  0xfa   : > { %1020 = vrot.lane.b32.xlu0 %v2121_v32, %s1905_s8  ;;  %s1578_s8 = sshll.u32 %s2091_s18, 1 }
  0xfb   : > { %v330_v5 = vadd.f32 %v328_v63, %v306_v57  ;;  %v331_v6 = vadd.f32 %v329_v0, %v307_v58  ;;  %v335_v7 = vpop.permute.xlu1 %334  ;;  %v333_v8 = vpop.permute.xlu0 %332  ;;  %v465_v0 = vrot.slane %v460_v55, %v2113_v29 }
  0xfc   : > { %v337_v9 = vsel %vm336_vm5, %v333_v8, %v335_v7  ;;  %v338_v10 = vsel %vm336_vm5, %v335_v7, %v333_v8  ;;  %vm696_vm5 = vcmp.lt.s32.totalorder %v2184_v34, 15 }
  0xfd   : > { %v352_v11 = vmul.f32 %v345_v2, %v338_v10  ;;  %v353_v12 = vmul.f32 %v349_v3, %v337_v9  ;;  %1046 = vrot.lane.b32.xlu1 %v2125_v33, %s1906_s6  ;;  %v469_v2 = vrot.slane %v460_v55, %v2115_v30  ;;  %v484_v3 = vld [vmem:[#allocation3 + $0x11] ss:$8 sm:$0x3] }
  0xfe   : > { %1044 = vrot.lane.b32.xlu0 %v2121_v32, %s1906_s6  ;;  %s1587_s6 = sshll.u32 %s1858_s12, 5  ;;  %s1460_s12 = scalar_lea.sflag [#allocation5], %s2091_s18 }
  0xff   : > { %v354_v16 = vadd.f32 %v352_v11, %v330_v5  ;;  %v355_v17 = vadd.f32 %v353_v12, %v331_v6  ;;  %v359_v18 = vpop.permute.xlu1 %358  ;;  %v357_v19 = vpop.permute.xlu0 %356  ;;  %v489_v12 = vrot.slane %v484_v3, %v2113_v29 }
 0x100   : > { %v361_v20 = vsel %vm360_vm6, %v357_v19, %v359_v18  ;;  %v362_v21 = vsel %vm360_vm6, %v359_v18, %v357_v19  ;;  %vm720_vm6 = vcmp.lt.s32.totalorder %v2184_v34, 14 }
 0x101   : > { %v376_v22 = vmul.f32 %v369_v13, %v362_v21  ;;  %v377_v24 = vmul.f32 %v373_v14, %v361_v20  ;;  %1070 = vrot.lane.b32.xlu1 %v2125_v33, %s1907_s15  ;;  %v493_v13 = vrot.slane %v484_v3, %v2115_v30  ;;  %v508_v14 = vld [vmem:[#allocation3 + $0x12] ss:$8 sm:$0x3] }
 0x102   : > { %1068 = vrot.lane.b32.xlu0 %v2121_v32, %s1907_s15  ;;  %s190_s15 = scalar_lea.vmem [#allocation8], %s1578_s8 }
 0x103   : > { %v378_v28 = vadd.f32 %v376_v22, %v354_v16  ;;  %v379_v35 = vadd.f32 %v377_v24, %v355_v17  ;;  %v383_v36 = vpop.permute.xlu1 %382  ;;  %v381_v37 = vpop.permute.xlu0 %380  ;;  %v513_v24 = vrot.slane %v508_v14, %v2113_v29 }
 0x104   : > { %v385_v38 = vsel %vm384_vm7, %v381_v37, %v383_v36  ;;  %v386_v39 = vsel %vm384_vm7, %v383_v36, %v381_v37  ;;  %vm744_vm7 = vcmp.lt.s32.totalorder %v2184_v34, 13 }
 0x105   : > { %v400_v40 = vmul.f32 %v393_v25, %v386_v39  ;;  %v401_v41 = vmul.f32 %v397_v26, %v385_v38  ;;  %1094 = vrot.lane.b32.xlu1 %v2125_v33, %s1908_s17  ;;  %v517_v25 = vrot.slane %v508_v14, %v2115_v30  ;;  %v532_v26 = vld [vmem:[#allocation3 + $0x13] ss:$8 sm:$0x3] }
 0x106   : > { %1092 = vrot.lane.b32.xlu0 %v2121_v32, %s1908_s17  ;;  %s1474_s17 = sshll.u32 %s190_s15, 4  ;;  %s2802_s17 = int_to_ptr.vmem [resolvable:$true] %s1474_s17 }
 0x107   : > { %v402_v45 = vadd.f32 %v400_v40, %v378_v28  ;;  %v403_v46 = vadd.f32 %v401_v41, %v379_v35  ;;  %v407_v47 = vpop.permute.xlu1 %406  ;;  %v405_v48 = vpop.permute.xlu0 %404  ;;  %v537_v41 = vrot.slane %v532_v26, %v2113_v29 }
 0x108   : > { %v409_v49 = vsel %vm408_vm8, %v405_v48, %v407_v47  ;;  %v410_v50 = vsel %vm408_vm8, %v407_v47, %v405_v48  ;;  %vm768_vm8 = vcmp.lt.s32.totalorder %v2184_v34, 3 }
 0x109   : > { %v424_v51 = vmul.f32 %v417_v42, %v410_v50  ;;  %v425_v52 = vmul.f32 %v421_v43, %v409_v49  ;;  %1118 = vrot.lane.b32.xlu1 %v2125_v33, %s1909_s19  ;;  %v541_v42 = vrot.slane %v532_v26, %v2115_v30  ;;  %v556_v43 = vld [vmem:[#allocation3 + $0x14] ss:$8 sm:$0x3] }
 0x10a   : > { %1116 = vrot.lane.b32.xlu0 %v2121_v32, %s1909_s19 }
 0x10b   : > { %v426_v56 = vadd.f32 %v424_v51, %v402_v45  ;;  %v427_v57 = vadd.f32 %v425_v52, %v403_v46  ;;  %v431_v58 = vpop.permute.xlu1 %430  ;;  %v429_v59 = vpop.permute.xlu0 %428  ;;  %v561_v52 = vrot.slane %v556_v43, %v2113_v29 }
 0x10c   : > { %v433_v60 = vsel %vm432_vm9, %v429_v59, %v431_v58  ;;  %v434_v61 = vsel %vm432_vm9, %v431_v58, %v429_v59  ;;  %vm792_vm9 = vcmp.lt.s32.totalorder %v2184_v34, 2 }
 0x10d   : > { %v448_v62 = vmul.f32 %v441_v53, %v434_v61  ;;  %v449_v63 = vmul.f32 %v445_v54, %v433_v60  ;;  %1142 = vrot.lane.b32.xlu1 %v2125_v33, %s1910_s21  ;;  %v565_v53 = vrot.slane %v556_v43, %v2115_v30  ;;  %v580_v54 = vld [vmem:[#allocation3 + $0x15] ss:$8 sm:$0x3] }
 0x10e   : > { %1140 = vrot.lane.b32.xlu0 %v2121_v32, %s1910_s21 }
 0x10f   : > { %v450_v4 = vadd.f32 %v448_v62, %v426_v56  ;;  %v451_v5 = vadd.f32 %v449_v63, %v427_v57  ;;  %v455_v6 = vpop.permute.xlu1 %454  ;;  %v453_v7 = vpop.permute.xlu0 %452  ;;  %v585_v63 = vrot.slane %v580_v54, %v2113_v29 }
 0x110   : > { %v457_v8 = vsel %vm456_vm10, %v453_v7, %v455_v6  ;;  %v458_v9 = vsel %vm456_vm10, %v455_v6, %v453_v7  ;;  %vm816_vm10 = vcmp.lt.s32.totalorder %v2184_v34, 1 }
 0x111   : > { %v472_v10 = vmul.f32 %v465_v0, %v458_v9  ;;  %v473_v11 = vmul.f32 %v469_v2, %v457_v8  ;;  %1166 = vrot.lane.b32.xlu1 %v2125_v33, %s1911_s4  ;;  %v589_v0 = vrot.slane %v580_v54, %v2115_v30  ;;  %v604_v2 = vld [vmem:[#allocation3 + $0x16] ss:$8 sm:$0x3]  ;;  %v628_v54 = vld [vmem:[#allocation3 + $0x17] ss:$8 sm:$0x3] }
 0x112   : > { %1164 = vrot.lane.b32.xlu0 %v2121_v32, %s1911_s4  ;;  %s2800_s4 = scalar_lea.hbm %s2853_s2, %s1587_s6 }
 0x113   : > { %v474_v15 = vadd.f32 %v472_v10, %v450_v4  ;;  %v475_v16 = vadd.f32 %v473_v11, %v451_v5  ;;  %v479_v17 = vpop.permute.xlu1 %478  ;;  %v477_v18 = vpop.permute.xlu0 %476  ;;  %v609_v11 = vrot.slane %v604_v2, %v2113_v29 }
 0x114   : > { %v481_v19 = vsel %vm480_vm11, %v477_v18, %v479_v17  ;;  %v482_v20 = vsel %vm480_vm11, %v479_v17, %v477_v18  ;;  %vm856_vm11 = vcmp.lt.s32.totalorder %v2184_v34, 127 }
 0x115   : > { %v496_v21 = vmul.f32 %v489_v12, %v482_v20  ;;  %v497_v22 = vmul.f32 %v493_v13, %v481_v19  ;;  %1190 = vrot.lane.b32.xlu1 %v2125_v33, %s1912_s5  ;;  %v613_v12 = vrot.slane %v604_v2, %v2115_v30 }
 0x116   : > { %1188 = vrot.lane.b32.xlu0 %v2121_v32, %s1912_s5  ;;  %s1780_s5 = scalar_lea.vmem %s2802_s17, 32 }
 0x117   : > { %v498_v27 = vadd.f32 %v496_v21, %v474_v15  ;;  %v499_v28 = vadd.f32 %v497_v22, %v475_v16  ;;  %v503_v35 = vpop.permute.xlu1 %502  ;;  %v501_v36 = vpop.permute.xlu0 %500  ;;  %p1781_p13 = scmp.ne.s32.totalorder %s2802_s17, %s1780_s5 }
 0x118   : > { %v505_v37 = vsel %vm504_vm12, %v501_v36, %v503_v35  ;;  %v506_v38 = vsel %vm504_vm12, %v503_v35, %v501_v36  ;;  %vm880_vm12 = vcmp.lt.s32.totalorder %v2184_v34, 126 }
 0x119   : > { %v520_v39 = vmul.f32 %v513_v24, %v506_v38  ;;  %v521_v40 = vmul.f32 %v517_v25, %v505_v37  ;;  %1214 = vrot.lane.b32.xlu1 %v2125_v33, %s1913_s7  ;;  %p1782_p6 = pnand %p1781_p13, %p2034_p10 }
 0x11a   : > { %1212 = vrot.lane.b32.xlu0 %v2121_v32, %s1913_s7  ;;  %s1922_s7 = smov [#allocation8]  }
 0x11b   : > { %v522_v44 = vadd.f32 %v520_v39, %v498_v27  ;;  %v523_v45 = vadd.f32 %v521_v40, %v499_v28  ;;  %v527_v46 = vpop.permute.xlu1 %526  ;;  %v525_v47 = vpop.permute.xlu0 %524  ;;  %p1783_p8 = pneg %p1782_p6 }
 0x11c   : > { %v529_v48 = vsel %vm528_vm13, %v525_v47, %v527_v46  ;;  %v530_v49 = vsel %vm528_vm13, %v527_v46, %v525_v47  ;;  %vm904_vm13 = vcmp.lt.s32.totalorder %v2184_v34, 125 }
 0x11d   : > { %v544_v50 = vmul.f32 %v537_v41, %v530_v49  ;;  %v545_v51 = vmul.f32 %v541_v42, %v529_v48  ;;  %1238 = vrot.lane.b32.xlu1 %v2125_v33, %s1914_s16 }
 0x11e   : > { %1236 = vrot.lane.b32.xlu0 %v2121_v32, %s1914_s16  ;;  %s1784_s16 = sshll.u32 %s1922_s7, 4  ;;  %s1785_s16 = int_to_ptr.vmem [resolvable:$false] %s1784_s16 }
 0x11f   : > { %v546_v55 = vadd.f32 %v544_v50, %v522_v44  ;;  %v547_v56 = vadd.f32 %v545_v51, %v523_v45  ;;  %v551_v57 = vpop.permute.xlu1 %550  ;;  %v549_v58 = vpop.permute.xlu0 %548  ;;  %p1787_p12 = scmp.lt.s32.totalorder %s2802_s17, %s1785_s16 }
 0x120   : > { %v553_v59 = vsel %vm552_vm14, %v549_v58, %v551_v57  ;;  %v554_v60 = vsel %vm552_vm14, %v551_v57, %v549_v58  ;;  %v652_v57 = vld [vmem:[#allocation3 + $0x20] ss:$8 sm:$0x3]  ;;  %v676_v58 = vld [vmem:[#allocation3 + $0x21] ss:$8 sm:$0x3] }
 0x121   : > { %v568_v61 = vmul.f32 %v561_v52, %v554_v60  ;;  %v569_v62 = vmul.f32 %v565_v53, %v553_v59  ;;  %1262 = vrot.lane.b32.xlu1 %v2125_v33, %s1915_s24  ;;  %v633_v59 = vrot.slane %v628_v54, %v2113_v29  ;;  %v637_v60 = vrot.slane %v628_v54, %v2115_v30 }
 0x122   : > { %1260 = vrot.lane.b32.xlu0 %v2121_v32, %s1915_s24  ;;  %v661_v2 = vrot.slane %v652_v57, %v2115_v30  ;;  %vm928_vm14 = vcmp.lt.s32.totalorder %v2184_v34, 115  ;;  %s1786_s24 = scalar_lea.vmem %s1785_s16, 64 }
 0x123   : > { %v570_v3 = vadd.f32 %v568_v61, %v546_v55  ;;  %v571_v4 = vadd.f32 %v569_v62, %v547_v56  ;;  %v575_v5 = vpop.permute.xlu1 %574  ;;  %v573_v6 = vpop.permute.xlu0 %572  ;;  %v700_v61 = vld [vmem:[#allocation3 + $0x22] ss:$8 sm:$0x3]  ;;  %p1788_p11 = scmp.lt.s32.totalorder %s1786_s24, %s1780_s5 }
 0x124   : > { %v577_v7 = vsel %vm576_vm15, %v573_v6, %v575_v5  ;;  %v578_v8 = vsel %vm576_vm15, %v575_v5, %v573_v6  ;;  %v681_v6 = vrot.slane %v676_v58, %v2113_v29  ;;  %vm952_vm15 = vcmp.lt.s32.totalorder %v2184_v34, 114 }
 0x125   : > { %v592_v9 = vmul.f32 %v585_v63, %v578_v8  ;;  %v593_v10 = vmul.f32 %v589_v0, %v577_v7  ;;  %1286 = vrot.lane.b32.xlu1 %v2125_v33, %s1916_s22  ;;  %v657_v0 = vrot.slane %v652_v57, %v2113_v29  ;;  %v685_v7 = vrot.slane %v676_v58, %v2115_v30  ;;  %p1789_p0 = por %p1788_p11, %p1787_p12 }
 0x126   : > { %1284 = vrot.lane.b32.xlu0 %v2121_v32, %s1916_s22 }
 0x127   : > { %v594_v13 = vadd.f32 %v592_v9, %v570_v3  ;;  %v595_v14 = vadd.f32 %v593_v10, %v571_v4  ;;  %v599_v15 = vpop.permute.xlu1 %598  ;;  %v597_v16 = vpop.permute.xlu0 %596  ;;  %v724_v3 = vld [vmem:[#allocation3 + $0x23] ss:$8 sm:$0x3]  ;;  %v705_v10 = vrot.slane %v700_v61, %v2113_v29  ;;  %p1790_p5 = pnand %p1789_p0, %p1783_p8 }
 0x128   : > { %v601_v17 = vsel %vm600_vm1, %v597_v16, %v599_v15  ;;  %v602_v18 = vsel %vm600_vm1, %v599_v15, %v597_v16  ;;  %v729_v15 = vrot.slane %v724_v3, %v2113_v29  ;;  %v772_v16 = vld [vmem:[#allocation3 + $0x25] ss:$8 sm:$0x3]  ;;  %vm976_vm1 = vcmp.lt.s32.totalorder %v2184_v34, 113 }
 0x129   : > { %v616_v19 = vmul.f32 %v609_v11, %v602_v18  ;;  %v617_v20 = vmul.f32 %v613_v12, %v601_v17  ;;  %1310 = vrot.lane.b32.xlu1 %v2125_v33, %s1917_s27  ;;  %v709_v11 = vrot.slane %v700_v61, %v2115_v30  ;;  %v748_v12 = vld [vmem:[#allocation3 + $0x24] ss:$8 sm:$0x3] }
 0x12a   : > { %1308 = vrot.lane.b32.xlu0 %v2121_v32, %s1917_s27 }
 0x12b   : > { %v2271_v21 = vadd.f32 %v616_v19, %v594_v13  ;;  %v2273_v22 = vadd.f32 %v617_v20, %v595_v14  ;;  %v623_v24 = vpop.permute.xlu1 %622  ;;  %v621_v25 = vpop.permute.xlu0 %620  ;;  %v733_v19 = vrot.slane %v724_v3, %v2115_v30 }
 0x12c   : > { %v625_v62 = vsel %vm624_vm2, %v621_v25, %v623_v24  ;;  %v626_v63 = vsel %vm624_vm2, %v623_v24, %v621_v25  ;;  %vm1000_vm2 = vcmp.lt.s32.totalorder %v2184_v34, 112 }
 0x12d   : > { %1334 = vrot.lane.b32.xlu1 %v2125_v33, %s1918_s23  ;;  %v640_v13 = vmul.f32 %v633_v59, %v626_v63  ;;  %v641_v14 = vmul.f32 %v637_v60, %v625_v62  ;;  %v796_v62 = vld [vmem:[#allocation3 + $0x26] ss:$8 sm:$0x3] }
 0x12e   : > { %1332 = vrot.lane.b32.xlu0 %v2121_v32, %s1918_s23 }
 0x12f   : > { %v647_v26 = vpop.permute.xlu1 %646  ;;  %v645_v27 = vpop.permute.xlu0 %644  ;;  %v642_v58 = vadd.f32 %v640_v13, %v2271_v21  ;;  %v643_v59 = vadd.f32 %v641_v14, %v2273_v22  ;;  %v837_v14 = vld [vmem:[#allocation3 + $0x30] ss:$8 sm:$0x3] }
 0x130   : > { %v649_v8 = vsel %vm648_vm3, %v645_v27, %v647_v26  ;;  %v650_v9 = vsel %vm648_vm3, %v647_v26, %v645_v27  ;;  %v753_v26 = vrot.slane %v748_v12, %v2113_v29  ;;  %v757_v27 = vrot.slane %v748_v12, %v2115_v30 }
 0x131   : > { %1358 = vrot.lane.b32.xlu1 %v2125_v33, %s1919_s29  ;;  %v664_v24 = vmul.f32 %v657_v0, %v650_v9  ;;  %v665_v25 = vmul.f32 %v661_v2, %v649_v8  ;;  %v805_v9 = vrot.slane %v796_v62, %v2115_v30  ;;  %vm1024_vm3 = vcmp.lt.s32.totalorder %v2184_v34, 111 }
 0x132   : > { %1356 = vrot.lane.b32.xlu0 %v2121_v32, %s1919_s29 }
 0x133   : > { %v671_v28 = vpop.permute.xlu1 %670  ;;  %v669_v35 = vpop.permute.xlu0 %668  ;;  %v666_v22 = vadd.f32 %v664_v24, %v642_v58  ;;  %v667_v0 = vadd.f32 %v665_v25, %v643_v59 }
 0x134   : > { %v673_v17 = vsel %vm672_vm4, %v669_v35, %v671_v28  ;;  %v674_v18 = vsel %vm672_vm4, %v671_v28, %v669_v35  ;;  %v777_v35 = vrot.slane %v772_v16, %v2113_v29  ;;  %vm1048_vm4 = vcmp.lt.s32.totalorder %v2184_v34, 110 }
 0x135   : > { %1382 = vrot.lane.b32.xlu1 %v2125_v33, %s1920_s30  ;;  %v688_v60 = vmul.f32 %v681_v6, %v674_v18  ;;  %v689_v61 = vmul.f32 %v685_v7, %v673_v17  ;;  %v820_v6 = vld [vmem:[#allocation3 + $0x27] ss:$8 sm:$0x3] }
 0x136   : > { %1380 = vrot.lane.b32.xlu0 %v2121_v32, %s1920_s30 }
 0x137   : > { %v2281_v36 = vpop.permute.xlu1 %694  ;;  %v2283_v37 = vpop.permute.xlu0 %692  ;;  %v690_v12 = vadd.f32 %v688_v60, %v666_v22  ;;  %v884_v22 = vld [vmem:[#allocation3 + $0x32] ss:$8 sm:$0x3] }
 0x138   : > { %v697_v57 = vsel %vm696_vm5, %v2283_v37, %v2281_v36  ;;  %v698_v28 = vsel %vm696_vm5, %v2281_v36, %v2283_v37  ;;  %v781_v37 = vrot.slane %v772_v16, %v2115_v30  ;;  %vm1072_vm5 = vcmp.lt.s32.totalorder %v2184_v34, 109 }
 0x139   : > { %1406 = vrot.lane.b32.xlu1 %v2125_v33, %s1921_s3  ;;  %v712_v2 = vmul.f32 %v705_v10, %v698_v28  ;;  %v713_v3 = vmul.f32 %v709_v11, %v697_v57  ;;  %v691_v10 = vadd.f32 %v689_v61, %v667_v0  ;;  %v838_v28 = vmul.f32 %v837_v14, %v2117_v31  ;;  %v2438_v14 = vld [vmem:[#allocation3 + $0x35] ss:$8 sm:$0x3] }
 0x13a   : > { %1404 = vrot.lane.b32.xlu0 %v2121_v32, %s1921_s3 }
 0x13b   : > { %v2287_v38 = vpop.permute.xlu1 %718  ;;  %v2289_v39 = vpop.permute.xlu0 %716  ;;  %v714_v18 = vadd.f32 %v712_v2, %v690_v12  ;;  %v847_v0 = vrot.slane %v838_v28, %v2115_v30 }
 0x13c   : > { %v721_v63 = vsel %vm720_vm6, %v2289_v39, %v2287_v38  ;;  %v722_v36 = vsel %vm720_vm6, %v2287_v38, %v2289_v39  ;;  %v801_v39 = vrot.slane %v796_v62, %v2113_v29  ;;  %vm1096_vm6 = vcmp.lt.s32.totalorder %v2184_v34, 99 }
 0x13d   : > { %v736_v11 = vmul.f32 %v729_v15, %v722_v36  ;;  %v737_v13 = vmul.f32 %v733_v19, %v721_v63  ;;  %v715_v15 = vadd.f32 %v713_v3, %v691_v10  ;;  %v860_v36 = vld [vmem:[#allocation3 + $0x31] ss:$8 sm:$0x3] }
 0x13f   : > { %v2291_v40 = vpop.permute.xlu1 %742  ;;  %v2293_v41 = vpop.permute.xlu0 %740  ;;  %v738_v58 = vadd.f32 %v736_v11, %v714_v18  ;;  %v739_v59 = vadd.f32 %v737_v13, %v715_v15  ;;  %v893_v13 = vrot.slane %v884_v22, %v2115_v30  ;;  %v2447_v15 = vld [vmem:[#allocation3 + $0x36] ss:$8 sm:$0x3] }
 0x140   : > { %v745_v8 = vsel %vm744_vm7, %v2293_v41, %v2291_v40  ;;  %v746_v38 = vsel %vm744_vm7, %v2291_v40, %v2293_v41  ;;  %v825_v40 = vrot.slane %v820_v6, %v2113_v29  ;;  %vm1120_vm7 = vcmp.lt.s32.totalorder %v2184_v34, 98 }
 0x141   : > { %v760_v19 = vmul.f32 %v753_v26, %v746_v38  ;;  %v761_v24 = vmul.f32 %v757_v27, %v745_v8  ;;  %v2428_v8 = vld [vmem:[#allocation3 + $0x34] ss:$8 sm:$0x3]  ;;  %v865_v38 = vrot.slane %v860_v36, %v2113_v29 }
 0x142   : > { %v937_v18 = vrot.slane %v2428_v8, %v2113_v29 }
 0x143   : > { %v2295_v42 = vpop.permute.xlu1 %766  ;;  %v2297_v43 = vpop.permute.xlu0 %764 }
 0x144   : > { %v769_v16 = vsel %vm768_vm8, %v2297_v43, %v2295_v42  ;;  %v770_v17 = vsel %vm768_vm8, %v2295_v42, %v2297_v43  ;;  %v829_v43 = vrot.slane %v820_v6, %v2115_v30  ;;  %vm1144_vm8 = vcmp.lt.s32.totalorder %v2184_v34, 97 }
 0x145   : > { %v784_v26 = vmul.f32 %v777_v35, %v770_v17  ;;  %v785_v27 = vmul.f32 %v781_v37, %v769_v16  ;;  %v843_v37 = vrot.slane %v838_v28, %v2113_v29 }
 0x147   : > { %v2299_v44 = vpop.permute.xlu1 %790  ;;  %v2301_v45 = vpop.permute.xlu0 %788 }
 0x148   : > { %v793_v57 = vsel %vm792_vm9, %v2301_v45, %v2299_v44  ;;  %v794_v42 = vsel %vm792_vm9, %v2299_v44, %v2301_v45  ;;  %v762_v44 = vadd.f32 %v760_v19, %v738_v58  ;;  %v763_v45 = vadd.f32 %v761_v24, %v739_v59 }
 0x149   : > { %v808_v63 = vmul.f32 %v801_v39, %v794_v42  ;;  %v809_v31 = vmul.f32 %v805_v9, %v793_v57  ;;  %v869_v39 = vrot.slane %v860_v36, %v2115_v30  ;;  %v889_v9 = vrot.slane %v884_v22, %v2113_v29  ;;  %v2452_v42 = vld [vmem:[#allocation3 + $0x37] ss:$8 sm:$0x3] }
 0x14a   : > { %v786_v2 = vadd.f32 %v784_v26, %v762_v44  ;;  %v787_v3 = vadd.f32 %v785_v27, %v763_v45  ;;  %v941_v57 = vrot.slane %v2428_v8, %v2115_v30  ;;  %v961_v58 = vrot.slane %v2438_v14, %v2113_v29  ;;  %v2508_v8 = vld [vmem:[#allocation3 + $0x42] ss:$8 sm:$0x3] }
 0x14b   : > { %v2303_v46 = vpop.permute.xlu1 %814  ;;  %v2305_v33 = vpop.permute.xlu0 %812  ;;  %v965_v59 = vrot.slane %v2438_v14, %v2115_v30  ;;  %v985_v27 = vrot.slane %v2447_v15, %v2113_v29  ;;  %v1009_v45 = vrot.slane %v2452_v42, %v2113_v29  ;;  %vm1168_vm9 = vcmp.lt.s32.totalorder %v2184_v34, 96 }
 0x14c   : > { %v817_v60 = vsel %vm816_vm10, %v2305_v33, %v2303_v46  ;;  %v818_v61 = vsel %vm816_vm10, %v2303_v46, %v2305_v33  ;;  %v908_v33 = vld [vmem:[#allocation3 + $0x33] ss:$8 sm:$0x3]  ;;  %v810_v10 = vadd.f32 %v808_v63, %v786_v2  ;;  %v811_v11 = vadd.f32 %v809_v31, %v787_v3  ;;  %v2490_v3 = vld [vmem:[#allocation3 + $0x41] ss:$8 sm:$0x3] }
 0x14d   : > { %v832_v6 = vmul.f32 %v825_v40, %v818_v61  ;;  %v833_v46 = vmul.f32 %v829_v43, %v817_v60  ;;  %v913_v17 = vrot.slane %v908_v33, %v2113_v29  ;;  %v917_v40 = vrot.slane %v908_v33, %v2115_v30  ;;  %v2474_v61 = vld [vmem:[#allocation3 + $0x40] ss:$8 sm:$0x3] }
 0x14e   : > { %v989_v60 = vrot.slane %v2447_v15, %v2115_v30  ;;  %v1013_v63 = vrot.slane %v2452_v42, %v2115_v30  ;;  %v1037_v33 = vrot.slane %v2474_v61, %v2115_v30  ;;  %vm1192_vm10 = vcmp.lt.s32.totalorder %v2184_v34, 95 }
 0x14f   : > { %v2307_v32 = vpop.permute.xlu1 %854  ;;  %v2309_v47 = vpop.permute.xlu0 %852  ;;  %v834_v19 = vadd.f32 %v832_v6, %v810_v10  ;;  %v835_v24 = vadd.f32 %v833_v46, %v811_v11 }
 0x150   : > { %v857_v43 = vsel %vm856_vm11, %v2309_v47, %v2307_v32  ;;  %v858_v28 = vsel %vm856_vm11, %v2307_v32, %v2309_v47  ;;  %vm1216_vm11 = vcmp.lt.s32.totalorder %v2184_v34, 94 }
 0x151   : > { %v850_v31 = vadd.f32 %v843_v37, %v834_v19  ;;  %v851_v36 = vadd.f32 %v847_v0, %v835_v24  ;;  %v872_v22 = vmul.f32 %v865_v38, %v857_v43  ;;  %v873_v2 = vmul.f32 %v869_v39, %v858_v28  ;;  %v2525_v19 = vld [vmem:[#allocation3 + $0x43] ss:$8 sm:$0x3] }
 0x152   : > { %v1057_v39 = vrot.slane %v2490_v3, %v2113_v29 }
 0x153   : > { %v2311_v48 = vpop.permute.xlu1 %878  ;;  %v2313_v49 = vpop.permute.xlu0 %876  ;;  %v874_v10 = vadd.f32 %v872_v22, %v850_v31  ;;  %v875_v11 = vadd.f32 %v873_v2, %v851_v36  ;;  %v2542_v31 = vld [vmem:[#allocation3 + $0x44] ss:$8 sm:$0x3] }
 0x154   : > { %v881_v47 = vsel %vm880_vm12, %v2313_v49, %v2311_v48  ;;  %v882_v44 = vsel %vm880_vm12, %v2311_v48, %v2313_v49  ;;  %v1033_v49 = vrot.slane %v2474_v61, %v2113_v29  ;;  %vm1240_vm12 = vcmp.lt.s32.totalorder %v2184_v34, 93 }
 0x155   : > { %v896_v0 = vmul.f32 %v889_v9, %v881_v47  ;;  %v897_v46 = vmul.f32 %v893_v13, %v882_v44  ;;  %v1061_v9 = vrot.slane %v2490_v3, %v2115_v30 }
 0x157   : > { %v2315_v50 = vpop.permute.xlu1 %902  ;;  %v2317_v51 = vpop.permute.xlu0 %900  ;;  %v898_v43 = vadd.f32 %v896_v0, %v874_v10  ;;  %v899_v28 = vadd.f32 %v897_v46, %v875_v11  ;;  %v2559_v0 = vld [vmem:[#allocation3 + $0x45] ss:$8 sm:$0x3] }
 0x158   : > { %v905_v6 = vsel %vm904_vm13, %v2317_v51, %v2315_v50  ;;  %v906_v48 = vsel %vm904_vm13, %v2315_v50, %v2317_v51  ;;  %v1153_v15 = vrot.slane %v2559_v0, %v2113_v29  ;;  %vm1264_vm13 = vcmp.lt.s32.totalorder %v2184_v34, 83 }
 0x159   : > { %v920_v13 = vmul.f32 %v913_v17, %v905_v6  ;;  %v921_v14 = vmul.f32 %v917_v40, %v906_v48  ;;  %v1085_v17 = vrot.slane %v2508_v8, %v2115_v30 }
 0x15b   : > { %v2319_v52 = vpop.permute.xlu1 %926  ;;  %v2321_v53 = vpop.permute.xlu0 %924  ;;  %v922_v22 = vadd.f32 %v920_v13, %v898_v43  ;;  %v923_v2 = vadd.f32 %v921_v14, %v899_v28  ;;  %v2605_v28 = vld [vmem:[#allocation3 + $0x47] ss:$8 sm:$0x3] }
 0x15c   : > { %v929_v50 = vsel %vm928_vm14, %v2321_v53, %v2319_v52  ;;  %v930_v51 = vsel %vm928_vm14, %v2319_v52, %v2321_v53  ;;  %v1081_v53 = vrot.slane %v2508_v8, %v2113_v29  ;;  %v1205_v61 = vrot.slane %v2605_v28, %v2115_v30 }
 0x15d   : > { %v944_v47 = vmul.f32 %v937_v18, %v929_v50  ;;  %v945_v44 = vmul.f32 %v941_v57, %v930_v51  ;;  %v1105_v18 = vrot.slane %v2525_v19, %v2113_v29  ;;  %v1109_v57 = vrot.slane %v2525_v19, %v2115_v30 }
 0x15e   : > { %vm1288_vm14 = vcmp.lt.s32.totalorder %v2184_v34, 82 }
 0x15f   : > { %v2323_v55 = vpop.permute.xlu1 %950  ;;  %v2325_v56 = vpop.permute.xlu0 %948  ;;  %v946_v50 = vadd.f32 %v944_v47, %v922_v22  ;;  %v947_v51 = vadd.f32 %v945_v44, %v923_v2 }
 0x160   : > { %v953_v24 = vsel %vm952_vm15, %v2325_v56, %v2323_v55  ;;  %v954_v52 = vsel %vm952_vm15, %v2323_v55, %v2325_v56  ;;  %vm1312_vm15 = vcmp.lt.s32.totalorder %v2184_v34, 81 }
 0x161   : > { %v968_v6 = vmul.f32 %v961_v58, %v953_v24  ;;  %v969_v48 = vmul.f32 %v965_v59, %v954_v52  ;;  %v1133_v58 = vrot.slane %v2542_v31, %v2115_v30 }
 0x163   : > { %v2333_v4 = vpop.permute.xlu1 %974  ;;  %v2335_v5 = vpop.permute.xlu0 %972  ;;  %v970_v14 = vadd.f32 %v968_v6, %v946_v50  ;;  %v971_v24 = vadd.f32 %v969_v48, %v947_v51 }
 0x164   : > { %v977_v55 = vsel %vm976_vm1, %v2335_v5, %v2333_v4  ;;  %v978_v56 = vsel %vm976_vm1, %v2333_v4, %v2335_v5  ;;  %v1129_v5 = vrot.slane %v2542_v31, %v2113_v29  ;;  %vm1336_vm1 = vcmp.lt.s32.totalorder %v2184_v34, 80 }
 0x165   : > { %v992_v10 = vmul.f32 %v985_v27, %v977_v55  ;;  %v993_v11 = vmul.f32 %v989_v60, %v978_v56  ;;  %v1157_v60 = vrot.slane %v2559_v0, %v2115_v30 }
 0x167   : > { %v2347_v20 = vpop.permute.xlu1 %998  ;;  %v994_v47 = vadd.f32 %v992_v10, %v970_v14  ;;  %v995_v44 = vadd.f32 %v993_v11, %v971_v24  ;;  %v2665_v10 = vld [vmem:[#allocation3 + $0x51] ss:$8 sm:$0x3]  ;;  %v2684_v14 = vld [vmem:[#allocation3 + $0x52] ss:$8 sm:$0x3] }
 0x168   : > { %v2351_v54 = vpop.permute.xlu0 %996  ;;  %v1249_v24 = vrot.slane %v2665_v10, %v2113_v29 }
 0x169   : > { %v1001_v46 = vsel %vm1000_vm2, %v2351_v54, %v2347_v20  ;;  %v1002_v4 = vsel %vm1000_vm2, %v2347_v20, %v2351_v54  ;;  %v2582_v20 = vld [vmem:[#allocation3 + $0x46] ss:$8 sm:$0x3]  ;;  %vm1360_vm2 = vcmp.lt.s32.totalorder %v2184_v34, 79 }
 0x16a   : > { %v1016_v52 = vmul.f32 %v1009_v45, %v1001_v46  ;;  %v1017_v43 = vmul.f32 %v1013_v63, %v1002_v4  ;;  %v1177_v45 = vrot.slane %v2582_v20, %v2113_v29  ;;  %v1181_v42 = vrot.slane %v2582_v20, %v2115_v30 }
 0x16b   : > { %v2375_v21 = vpop.permute.xlu1 %1022 }
 0x16c   : > { %v2377_v7 = vpop.permute.xlu0 %1020  ;;  %v1019_v6 = vadd.f32 %v1017_v43, %v995_v44  ;;  %v1292_v44 = vld [vmem:[#allocation3 + $0x53] ss:$8 sm:$0x3] }
 0x16d   : > { %v1025_v13 = vsel %vm1024_vm3, %v2377_v7, %v2375_v21  ;;  %v1026_v27 = vsel %vm1024_vm3, %v2375_v21, %v2377_v7  ;;  %vm1384_vm3 = vcmp.lt.s32.totalorder %v2184_v34, 78 }
 0x16e   : > { %v1040_v55 = vmul.f32 %v1033_v49, %v1025_v13  ;;  %v1041_v56 = vmul.f32 %v1037_v33, %v1026_v27  ;;  %v1201_v49 = vrot.slane %v2605_v28, %v2113_v29  ;;  %v1018_v33 = vadd.f32 %v1016_v52, %v994_v47 }
 0x16f   : > { %v2399_v41 = vpop.permute.xlu1 %1046 }
 0x170   : > { %v2401_v25 = vpop.permute.xlu0 %1044  ;;  %v1042_v50 = vadd.f32 %v1040_v55, %v1018_v33  ;;  %v1043_v51 = vadd.f32 %v1041_v56, %v1019_v6  ;;  %v1277_v55 = vrot.slane %v2684_v14, %v2115_v30  ;;  %v1297_v33 = vrot.slane %v1292_v44, %v2113_v29 }
 0x171   : > { %v1049_v21 = vsel %vm1048_vm4, %v2401_v25, %v2399_v41  ;;  %v1050_v7 = vsel %vm1048_vm4, %v2399_v41, %v2401_v25  ;;  %v2628_v41 = vld [vmem:[#allocation3 + $0x50] ss:$8 sm:$0x3]  ;;  %v1301_v6 = vrot.slane %v1292_v44, %v2115_v30  ;;  %vm1408_vm4 = vcmp.lt.s32.totalorder %v2184_v34, 77 }
 0x172   : > { %v1064_v48 = vmul.f32 %v1057_v39, %v1049_v21  ;;  %v1065_v46 = vmul.f32 %v1061_v9, %v1050_v7  ;;  %v1225_v4 = vrot.slane %v2628_v41, %v2113_v29 }
 0x173   : > { %v2421_v62 = vpop.permute.xlu1 %1070 }
 0x174   : > { %v2423_v35 = vpop.permute.xlu0 %1068  ;;  %v1066_v8 = vadd.f32 %v1064_v48, %v1042_v50 }
 0x175   : > { %v1073_v22 = vsel %vm1072_vm5, %v2423_v35, %v2421_v62  ;;  %v1074_v2 = vsel %vm1072_vm5, %v2421_v62, %v2423_v35 }
 0x176   : > { %v1088_v3 = vmul.f32 %v1081_v53, %v1073_v22  ;;  %v1089_v9 = vmul.f32 %v1085_v17, %v1074_v2  ;;  %v1229_v53 = vrot.slane %v2628_v41, %v2115_v30  ;;  %v1067_v17 = vadd.f32 %v1065_v46, %v1043_v51  ;;  %v1316_v2 = vld [vmem:[#allocation3 + $0x54] ss:$8 sm:$0x3] }
 0x177   : > { %v2434_v12 = vpop.permute.xlu1 %1094  ;;  %v1321_v50 = vrot.slane %v1316_v2, %v2113_v29 }
 0x178   : > { %v2440_v16 = vpop.permute.xlu0 %1092  ;;  %v1091_v52 = vadd.f32 %v1089_v9, %v1067_v17  ;;  %v1364_v17 = vld [vmem:[#allocation3 + $0x56] ss:$8 sm:$0x3] }
 0x179   : > { %v1097_v62 = vsel %vm1096_vm6, %v2440_v16, %v2434_v12  ;;  %v1098_v35 = vsel %vm1096_vm6, %v2434_v12, %v2440_v16 }
 0x17a   : > { %v1112_v13 = vmul.f32 %v1105_v18, %v1097_v62  ;;  %v1113_v27 = vmul.f32 %v1109_v57, %v1098_v35  ;;  %v1253_v18 = vrot.slane %v2665_v10, %v2115_v30  ;;  %v1090_v57 = vadd.f32 %v1088_v3, %v1066_v8  ;;  %v1340_v10 = vld [vmem:[#allocation3 + $0x55] ss:$8 sm:$0x3] }
 0x17b   : > { %v2466_v26 = vpop.permute.xlu1 %1118 }
 0x17c   : > { %v2476_v32 = vpop.permute.xlu0 %1116  ;;  %v1114_v7 = vadd.f32 %v1112_v13, %v1090_v57  ;;  %v1115_v47 = vadd.f32 %v1113_v27, %v1091_v52  ;;  %v1345_v27 = vrot.slane %v1340_v10, %v2113_v29 }
 0x17d   : > { %v1121_v12 = vsel %vm1120_vm7, %v2476_v32, %v2466_v26  ;;  %v1122_v16 = vsel %vm1120_vm7, %v2466_v26, %v2476_v32 }
 0x17e   : > { %v1136_v43 = vmul.f32 %v1129_v5, %v1121_v12  ;;  %v1137_v28 = vmul.f32 %v1133_v58, %v1122_v16  ;;  %v1273_v5 = vrot.slane %v2684_v14, %v2113_v29  ;;  %v1325_v12 = vrot.slane %v1316_v2, %v2115_v30 }
 0x17f   : > { %v2503_v37 = vpop.permute.xlu1 %1142  ;;  %v1349_v14 = vrot.slane %v1340_v10, %v2115_v30 }
 0x180   : > { %v2510_v38 = vpop.permute.xlu0 %1140  ;;  %v1139_v0 = vadd.f32 %v1137_v28, %v1115_v47 }
 0x181   : > { %v1145_v26 = vsel %vm1144_vm8, %v2510_v38, %v2503_v37  ;;  %v1146_v32 = vsel %vm1144_vm8, %v2503_v37, %v2510_v38 }
 0x182   : > { %v1160_v31 = vmul.f32 %v1153_v15, %v1145_v26  ;;  %v1161_v58 = vmul.f32 %v1157_v60, %v1146_v32  ;;  %v1138_v15 = vadd.f32 %v1136_v43, %v1114_v7  ;;  %v1369_v43 = vrot.slane %v1364_v17, %v2113_v29  ;;  %v1388_v7 = vld [vmem:[#allocation3 + $0x57] ss:$8 sm:$0x3] }
 0x183   : > { %v2539_v40 = vpop.permute.xlu1 %1166 }
 0x184   : > { %v2544_v36 = vpop.permute.xlu0 %1164  ;;  %v1162_v48 = vadd.f32 %v1160_v31, %v1138_v15 }
 0x185   : > { %v1169_v37 = vsel %vm1168_vm9, %v2544_v36, %v2539_v40  ;;  %v1170_v38 = vsel %vm1168_vm9, %v2539_v40, %v2544_v36 }
 0x186   : > { %v1184_v60 = vmul.f32 %v1177_v45, %v1169_v37  ;;  %v1185_v41 = vmul.f32 %v1181_v42, %v1170_v38  ;;  %v1163_v45 = vadd.f32 %v1161_v58, %v1139_v0  ;;  %v1373_v58 = vrot.slane %v1364_v17, %v2115_v30 }
 0x187   : > { %v2573_v59 = vpop.permute.xlu1 %1190 }
 0x188   : > { %v2584_v54 = vpop.permute.xlu0 %1188 }
 0x189   : > { %v1193_v40 = vsel %vm1192_vm10, %v2584_v54, %v2573_v59  ;;  %v1194_v36 = vsel %vm1192_vm10, %v2573_v59, %v2584_v54 }
 0x18a   : > { %v1208_v46 = vmul.f32 %v1201_v49, %v1193_v40  ;;  %v1209_v62 = vmul.f32 %v1205_v61, %v1194_v36 }
 0x18b   : > { %v2619_v63 = vpop.permute.xlu1 %1214 }
 0x18c   : > { %v1213_v25 = vpop.permute.xlu0 %1212 }
 0x18d   : > { %v1217_v59 = vsel %vm1216_vm11, %v1213_v25, %v2619_v63  ;;  %v1218_v54 = vsel %vm1216_vm11, %v2619_v63, %v1213_v25  ;;  %v1186_v63 = vadd.f32 %v1184_v60, %v1162_v48  ;;  %v1187_v25 = vadd.f32 %v1185_v41, %v1163_v45 }
 0x18e   : > { %v1232_v51 = vmul.f32 %v1225_v4, %v1217_v59  ;;  %v1233_v3 = vmul.f32 %v1229_v53, %v1218_v54  ;;  %v1393_v60 = vrot.slane %v1388_v7, %v2113_v29  ;;  %v1397_v41 = vrot.slane %v1388_v7, %v2115_v30 }
 0x18f   : > { %v1239_v39 = vpop.permute.xlu1 %1238 }
 0x190   : > { %v1237_v11 = vpop.permute.xlu0 %1236 }
 0x191   : > { %v1241_v20 = vsel %vm1240_vm12, %v1237_v11, %v1239_v39  ;;  %v1242_v42 = vsel %vm1240_vm12, %v1239_v39, %v1237_v11  ;;  %v1210_v39 = vadd.f32 %v1208_v46, %v1186_v63  ;;  %v1211_v11 = vadd.f32 %v1209_v62, %v1187_v25 }
 0x192   : > { %v1256_v16 = vmul.f32 %v1249_v24, %v1241_v20  ;;  %v1257_v8 = vmul.f32 %v1253_v18, %v1242_v42 }
 0x193   : > { %v1263_v19 = vpop.permute.xlu1 %1262  ;;  %v1234_v26 = vadd.f32 %v1232_v51, %v1210_v39  ;;  %v1235_v32 = vadd.f32 %v1233_v3, %v1211_v11 }
 0x194   : > { %v1261_v21 = vpop.permute.xlu0 %1260 }
 0x195   : > { %v1265_v49 = vsel %vm1264_vm13, %v1261_v21, %v1263_v19  ;;  %v1266_v61 = vsel %vm1264_vm13, %v1263_v19, %v1261_v21  ;;  %v1258_v28 = vadd.f32 %v1256_v16, %v1234_v26  ;;  %v1259_v21 = vadd.f32 %v1257_v8, %v1235_v32 }
 0x196   : > { %v1280_v19 = vmul.f32 %v1273_v5, %v1265_v49  ;;  %v1281_v57 = vmul.f32 %v1277_v55, %v1266_v61 }
 0x197   : > { %v1287_v56 = vpop.permute.xlu1 %1286 }
 0x198   : > { %v1285_v22 = vpop.permute.xlu0 %1284  ;;  %v1282_v44 = vadd.f32 %v1280_v19, %v1258_v28  ;;  %v1283_v40 = vadd.f32 %v1281_v57, %v1259_v21 }
 0x199   : > { %v1289_v4 = vsel %vm1288_vm14, %v1285_v22, %v1287_v56  ;;  %v1290_v53 = vsel %vm1288_vm14, %v1287_v56, %v1285_v22 }
 0x19a   : > { %v1304_v37 = vmul.f32 %v1297_v33, %v1289_v4  ;;  %v1305_v38 = vmul.f32 %v1301_v6, %v1290_v53  ;;  %v1412_v33 = vld [vmem:[#allocation3 + $0x60] ss:$8 sm:$0x3] }
 0x19b   : > { %v1311_v35 = vpop.permute.xlu1 %1310  ;;  %v1421_v63 = vrot.slane %v1412_v33, %v2115_v30 }
 0x19c   : > { %v1309_v9 = vpop.permute.xlu0 %1308  ;;  %v1306_v22 = vadd.f32 %v1304_v37, %v1282_v44  ;;  %v1307_v2 = vadd.f32 %v1305_v38, %v1283_v40 }
 0x19d   : > { %v1313_v24 = vsel %vm1312_vm15, %v1309_v9, %v1311_v35  ;;  %v1314_v18 = vsel %vm1312_vm15, %v1311_v35, %v1309_v9 }
 0x19e   : > { %v1328_v36 = vmul.f32 %v1321_v50, %v1313_v24  ;;  %v1329_v55 = vmul.f32 %v1325_v12, %v1314_v18  ;;  %v1417_v50 = vrot.slane %v1412_v33, %v2113_v29 }
 0x19f   : > { %v1335_v13 = vpop.permute.xlu1 %1334 }
 0x1a0   : > { %v1333_v52 = vpop.permute.xlu0 %1332  ;;  %v1330_v48 = vadd.f32 %v1328_v36, %v1306_v22  ;;  %v1331_v45 = vadd.f32 %v1329_v55, %v1307_v2 }
 0x1a1   : > { %v1337_v5 = vsel %vm1336_vm1, %v1333_v52, %v1335_v13  ;;  %v1338_v47 = vsel %vm1336_vm1, %v1335_v13, %v1333_v52 }
 0x1a2   : > { %v1352_v59 = vmul.f32 %v1345_v27, %v1337_v5  ;;  %v1353_v54 = vmul.f32 %v1349_v14, %v1338_v47 }
 0x1a3   : > { %v1359_v31 = vpop.permute.xlu1 %1358 }
 0x1a4   : > { %v1357_v56 = vpop.permute.xlu0 %1356  ;;  %v1354_v25 = vadd.f32 %v1352_v59, %v1330_v48  ;;  %v1355_v51 = vadd.f32 %v1353_v54, %v1331_v45 }
 0x1a5   : > { %v1361_v15 = vsel %vm1360_vm2, %v1357_v56, %v1359_v31  ;;  %v1362_v0 = vsel %vm1360_vm2, %v1359_v31, %v1357_v56 }
 0x1a6   : > { %v1376_v46 = vmul.f32 %v1369_v43, %v1361_v15  ;;  %v1377_v62 = vmul.f32 %v1373_v58, %v1362_v0 }
 0x1a7   : > { %v1383_v6 = vpop.permute.xlu1 %1382 }
 0x1a8   : > { %v1381_v20 = vpop.permute.xlu0 %1380  ;;  %v1378_v49 = vadd.f32 %v1376_v46, %v1354_v25  ;;  %v1379_v61 = vadd.f32 %v1377_v62, %v1355_v51 }
 0x1a9   : > { %v1385_v42 = vsel %vm1384_vm3, %v1381_v20, %v1383_v6  ;;  %v1386_v35 = vsel %vm1384_vm3, %v1383_v6, %v1381_v20 }
 0x1aa   : > { %v1400_v3 = vmul.f32 %v1393_v60, %v1385_v42  ;;  %v1401_v9 = vmul.f32 %v1397_v41, %v1386_v35 }
 0x1ab   : > { %v1407_v10 = vpop.permute.xlu1 %1406 }
 0x1ac   : > { %v1405_v12 = vpop.permute.xlu0 %1404  ;;  %v1402_v16 = vadd.f32 %v1400_v3, %v1378_v49  ;;  %v1403_v8 = vadd.f32 %v1401_v9, %v1379_v61 }
 0x1ad   : > { %v1409_v39 = vsel %vm1408_vm4, %v1405_v12, %v1407_v10  ;;  %v1410_v11 = vsel %vm1408_vm4, %v1407_v10, %v1405_v12 }
 0x1ae   : > { %v1424_v29 = vmul.f32 %v1417_v50, %v1409_v39  ;;  %v1425_v17 = vmul.f32 %v1421_v63, %v1410_v11 }
 0x1b0   : > { %v1426_v30 = vadd.f32 %v1424_v29, %v1402_v16  ;;  %v1427_v4 = vadd.f32 %v1425_v17, %v1403_v8 }
 0x1b2   : > { %v1579_v53 = vmul.f32 -1.442695, %v1426_v30  ;;  %v1580_v13 = vmul.f32 -1.442695, %v1427_v4 }
 0x1b4   : > { %1714 = vpow2.f32 %v1579_v53 }
 0x1b5   : > { %1716 = vpow2.f32 %v1580_v13 }
 0x1be   : > { %v1715_v27 = vpop.eup %1714 }
 0x1bf   : > { %v1717_v14 = vpop.eup %1716  ;;  %v1434_v26 = vadd.f32 1.0, %v1715_v27 }
 0x1c0   : > { %v1435_v32 = vadd.f32 1.0, %v1717_v14 }
 0x1c1   : > { %1718 = vrcp.f32 %v1434_v26 }
 0x1c2   : > { %1720 = vrcp.f32 %v1435_v32 }
 0x1cb   : > { %v1719_v34 = vpop.eup %1718 }
 0x1cc   : > { %v1721_v19 = vpop.eup %1720 }
 0x1cd   : > { %v1442_v57 = vcombine.low %v1719_v34, %v1721_v19 }
 0x1cf   : > { %v1449_v52 = vrot.slane %v1442_v57, %v2107_v23 }
 0x1d1   : > { %v1456_v24 = vrot.slane %v1449_v52, %v2107_v23 }
 0x1d3   : > { %1458 = vst.msk [vmem:[%s190_s15] sm:$0x3] %vm2100_vm0, %v1456_v24 }
 0x1d4   : > { %1793 = shalt.err (!%p1790_p5)
}
 0x1d5   : > { %s1794_s18 = scalar_lea.hbm %s2800_s4, 32  ;;  %s1798_s23 = scalar_lea.hbm %s2853_s2, 64 }
 0x1d6   : > { %p1795_p9 = scmp.ne.s32.totalorder %s2800_s4, %s1794_s18  ;;  %p1799_p7 = scmp.lt.u32.totalorder %s2800_s4, %s2853_s2 }
 0x1d7   : > { %p1800_p3 = scmp.lt.u32.totalorder %s1798_s23, %s1794_s18  ;;  %p1802_p13 = scmp.lt.u32.totalorder %s1794_s18, %s2800_s4 }
 0x1d8   : > { %p1796_p1 = pnand %p1795_p9, %p2034_p10 }
 0x1d9   : > { %p1801_p4 = por %p1800_p3, %p1799_p7 }
 0x1da   : > { %p1797_p2 = pneg %p1796_p1 }
 0x1db   : > { %p1803_p6 = por %p1802_p13, %p1801_p4 }
 0x1dd   : > { %p1804_p8 = pnand %p1803_p6, %p1797_p2 }
 0x1df   : > { %1807 = shalt.err (!%p1804_p8)
}
 0x1e0   : > { %1594 = dma.vmem_to_hbm [thread:$0]  (%p2034_p10), %s2802_s17, 32, %s2800_s4, %s1460_s12  }
 0x1e1 PF: > { %s1486_s3 = sand.u32 1, %s1846_s9   ;;  %p2873_p12 = scmp.ne.s32.totalorder %s2861_s20, 0 }
 0x1e2   : > { %p2874_p11 = scmp.ge.s32.totalorder %s1866_s14, 2  ;;  %s1487_s8 = scalar_lea.sflag [#allocation5], %s1486_s3 }
 0x1e4   : > { %p1605_p0 = pnand %p2874_p11, %p2873_p12 }
 0x1e6   : > { %1841 = dma.done.wait (!%p1605_p0), %s1487_s8, 32  }
 0x1e7   : > { %1843 = vsyncadd (!%p1605_p0), %s1487_s8, 4294967264  ;;  %s19_s14 = sadd.s32 1, %s1866_s14   ;;  %s2875_s9 = smov %s1850_s10 }
 0x1e8   : > { %p16_p5 = scmp.ge.s32.totalorder %s19_s14, 4   ;;  %s2876_s10 = smov %s1854_s11 }
 0x1e9   : > { %s2877_s11 = smov %s2043_s28  ;;  %s2878_s12 = smov %s1862_s13 }
 0x1ea   : > { %s2879_s13 = smov %s2881_s25  ;;  %18 = sbr.rel (!%p16_p5) target bundleno = 7 (0x7), region = 134 }
 0x1f1   :  { %1492 = vsyncpa [#allocation4], 1 }
 0x1f2   :  { %1494 = vsyncpa [#allocation4 + $0x1], 1 }
 0x1f3   :  { %1495 = vsyncpa [#allocation7], 1 }
 0x1f4   :  { %1497 = vsyncpa [#allocation7 + $0x1], 1 }
 0x1f5   :  { %1498 = vsyncpa [#allocation5], 1 }
 0x1f6   :  { %1500 = vsyncpa [#allocation5 + $0x1], 1 }

</bundles_post_ra>
